<compile_context>
chip_gen: v5e
topology: v5e:2x2
jax: 0.10.0
libtpu: 0.0.40
codegen_flags: <defaults>
</compile_context>

<pallas_src>
import functools
import math

import jax
import jax.numpy as jnp
from jax.experimental import pallas as pl
from jax.experimental.pallas import tpu as pltpu


# ---------------------------------------------------------------------------
# Fused Pallas kernel: one batch element per grid step.
# ---------------------------------------------------------------------------
def _nvdp_fused_kernel(xy_ref, xt_ref, encw_ref, encb_ref,
                       awh_ref, abh_ref, aw5_ref, ab5_ref,
                       wtx_ref, wth_ref, bvd_ref, tau_ref,
                       out_ref,
                       *, enc_dims, vd_dims, x_dim, y_dim, alpha, out_pad):
    f32 = jnp.float32

    # ---- det_encoder: 6-layer MLP (ReLU x5) + mean over context points ------------
    h = xy_ref[0]                                              # (Nc, x_dim + y_dim)
    n_enc = len(enc_dims)
    for l, (i_f, o_f) in enumerate(enc_dims):
        w = encw_ref[l, :i_f, :o_f]                            # (i_f, o_f)
        b = encb_ref[l, :, :o_f]                               # (1, o_f)
        h = jnp.dot(h, w, preferred_element_type=f32) + b
        if l < n_enc - 1:
            h = jnp.maximum(h, 0.0)                            # ReLU
    r = jnp.mean(h, axis=0, keepdims=True)                     # (1, r_dim)

    # ---- decoder: 4 VariationalDropoutNVDPbias layers ------------------------------
    x = xt_ref[0]                                              # (Nt, x_dim)
    nt = x.shape[0]
    h = None
    n_vd = len(vd_dims)
    for l, (in_f, out_f) in enumerate(vd_dims):
        # log_alpha_net: per-batch (M=1) work, hoisted out of the per-point math.
        a = r
        for j in range(4):
            a = jnp.dot(a, awh_ref[4 * l + j], preferred_element_type=f32) \
                + abh_ref[4 * l + j]
            a = jnp.where(a > 0, a, 0.1 * a)                   # LeakyReLU(0.1)
        tot = in_f + 2 * out_f + 1
        la = jnp.dot(a, aw5_ref[l, :, :tot], preferred_element_type=f32) \
            + ab5_ref[l, :, :tot]
        tau = jnp.clip(tau_ref[l], 0.5, 5.0)
        la = jnp.clip(la, alpha, 2.5) / tau                    # (1, tot)

        s1 = jax.nn.sigmoid(la[:, :in_f])                      # (1, in_f)
        s2 = jax.nn.sigmoid(la[:, in_f:in_f + out_f])          # (1, out_f)
        s3 = jax.nn.sigmoid(la[:, in_f + out_f:in_f + out_f + 1])   # (1, 1)
        pb = jax.nn.sigmoid(la[:, in_f + out_f + 1:tot])       # (1, out_f)

        b = bvd_ref[l, :, :out_f]                              # (1, out_f)
        g = s3 * s2                                            # (1, out_f)
        # x @ ((1-p) W)^T == x @ Wt - g * ((x*s1) @ Wt), with p[o,i] = s1[i]*s2[o]*s3.
        if l == 0:
            # g_1 input is [x_t, r] with r constant across points: keep the r-part as a
            # per-batch row (added like a bias) instead of materializing the concat.
            r_dim = in_f - x_dim
            s1x, s1r = s1[:, :x_dim], s1[:, x_dim:]
            wt_x = wtx_ref[...]                                # (x_dim, out_f)
            wt_r = wth_ref[0, :r_dim, :out_f]                  # (r_dim, out_f)
            x2 = jnp.concatenate([x, x * s1x], axis=0)         # (2*Nt, x_dim)
            yx = jnp.dot(x2, wt_x, preferred_element_type=f32)
            yr = jnp.dot(r, wt_r, preferred_element_type=f32)  # (1, out_f)
            ys = jnp.dot(r * s1r, wt_r, preferred_element_type=f32)
            h = (yx[:nt] + yr) - g * (yx[nt:] + ys) + (1.0 - pb) * b
        else:
            wt = wth_ref[l, :in_f, :out_f]                     # (in_f, out_f)
            h2 = jnp.concatenate([h, h * s1], axis=0)          # (2*Nt, in_f) -> 1 MXU push
            y2 = jnp.dot(h2, wt, preferred_element_type=f32)
            h = y2[:nt] - g * y2[nt:] + (1.0 - pb) * b
        if l < n_vd - 1:
            h = jnp.maximum(h, 0.0)                            # ReLU

    # ---- heads: [mu, 0.1 + 0.9*softplus(logstd)] written as a lane-dense slab ------
    col = jax.lax.broadcasted_iota(jnp.int32, h.shape, 1)
    mu_std = jnp.where(col < y_dim, h, 0.1 + 0.9 * jax.nn.softplus(h))   # (Nt, 2*y_dim)
    # Embed the 2*y_dim columns into a 128-wide slab with a tiny selector matmul
    # (avoids masked lane stores without any unaligned lane concatenation).
    sel_r = jax.lax.broadcasted_iota(jnp.int32, (2 * y_dim, out_pad), 0)
    sel_c = jax.lax.broadcasted_iota(jnp.int32, (2 * y_dim, out_pad), 1)
    sel = (sel_r == sel_c).astype(f32)                         # (2*y_dim, out_pad)
    out_ref[0] = jnp.dot(mu_std, sel, preferred_element_type=f32)


# ---------------------------------------------------------------------------
# Parameter packing: stack the many tiny weights into a few zero-padded arrays.
# ---------------------------------------------------------------------------
def pack_params(params, *, x_dim):
    f32 = jnp.float32
    enc = params["encoder"]                                     # list of (Wt(in,out), b(1,out))
    enc_dims = tuple(wt.shape for wt, _ in enc)
    de = max(max(i, o) for i, o in enc_dims)
    encw = jnp.zeros((len(enc), de, de), f32)
    encb = jnp.zeros((len(enc), 1, de), f32)
    for l, (wt, b) in enumerate(enc):
        i_f, o_f = wt.shape
        encw = encw.at[l, :i_f, :o_f].set(wt)
        encb = encb.at[l, :, :o_f].set(b)

    layers = [params["g1"], params["g2"], params["g3"], params["g4"]]
    vd_dims = tuple(layer["Wt"].shape for layer in layers)
    r_dim = enc[-1][0].shape[1]

    awh = jnp.stack([w for layer in layers for (w, _) in layer["alpha_net"][:4]])  # (16,r,r)
    abh = jnp.stack([c for layer in layers for (_, c) in layer["alpha_net"][:4]])  # (16,1,r)
    tmax = max(i + 2 * o + 1 for i, o in vd_dims)
    aw5 = jnp.zeros((len(layers), r_dim, tmax), f32)
    ab5 = jnp.zeros((len(layers), 1, tmax), f32)
    for l, layer in enumerate(layers):
        w5, c5 = layer["alpha_net"][4]
        t = w5.shape[1]
        aw5 = aw5.at[l, :, :t].set(w5)
        ab5 = ab5.at[l, :, :t].set(c5)

    wtx = layers[0]["Wt"][:x_dim, :]                            # (x_dim, h_dim)  (g1 x-part)
    hmax = max(r_dim, *(i for i, _ in vd_dims[1:]))
    omax = max(o for _, o in vd_dims)
    wth = jnp.zeros((len(layers), hmax, omax), f32)
    bvd = jnp.zeros((len(layers), 1, omax), f32)
    i0, o0 = vd_dims[0]
    wth = wth.at[0, :i0 - x_dim, :o0].set(layers[0]["Wt"][x_dim:, :])   # g1 r-part
    bvd = bvd.at[0, :, :o0].set(layers[0]["b"])
    for l in range(1, len(layers)):
        i_f, o_f = vd_dims[l]
        wth = wth.at[l, :i_f, :o_f].set(layers[l]["Wt"])
        bvd = bvd.at[l, :, :o_f].set(layers[l]["b"])
    taus = jnp.concatenate([layer["tau"].reshape(-1) for layer in layers])  # (4,)

    return {
        "x_dim": x_dim, "y_dim": vd_dims[-1][1] // 2,
        "enc_dims": enc_dims, "vd_dims": vd_dims,
        "encw": encw, "encb": encb, "awh": awh, "abh": abh,
        "aw5": aw5, "ab5": ab5, "wtx": wtx, "wth": wth, "bvd": bvd, "taus": taus,
    }


# ---------------------------------------------------------------------------
# pallas_call wrapper (single fused launch).
# ---------------------------------------------------------------------------
def _const_spec(shape):
    return pl.BlockSpec(shape, lambda b, n=len(shape): (0,) * n)


def model_nvdp_forward(packed, x_c, y_c, x_t, *, alpha):
    B, Nc, x_dim = x_c.shape
    y_dim = packed["y_dim"]
    Nt = x_t.shape[1]
    out_pad = max(128, ((2 * y_dim + 127) // 128) * 128)        # lane-dense output slab

    xy = jnp.concatenate([x_c, y_c], axis=-1)                   # (B, Nc, x_dim+y_dim), tiny

    kernel = functools.partial(
        _nvdp_fused_kernel,
        enc_dims=packed["enc_dims"], vd_dims=packed["vd_dims"],
        x_dim=x_dim, y_dim=y_dim, alpha=alpha, out_pad=out_pad)

    in_specs = [
        pl.BlockSpec((1, Nc, xy.shape[-1]), lambda b: (b, 0, 0)),
        pl.BlockSpec((1, Nt, x_dim), lambda b: (b, 0, 0)),
        _const_spec(packed["encw"].shape), _const_spec(packed["encb"].shape),
        _const_spec(packed["awh"].shape), _const_spec(packed["abh"].shape),
        _const_spec(packed["aw5"].shape), _const_spec(packed["ab5"].shape),
        _const_spec(packed["wtx"].shape), _const_spec(packed["wth"].shape),
        _const_spec(packed["bvd"].shape),
        pl.BlockSpec(memory_space=pltpu.MemorySpace.SMEM),      # taus (4,)
    ]

    out = pl.pallas_call(
        kernel,
        out_shape=jax.ShapeDtypeStruct((B, Nt, out_pad), jnp.float32),
        grid=(B,),
        in_specs=in_specs,
        out_specs=pl.BlockSpec((1, Nt, out_pad), lambda b: (b, 0, 0)),
        compiler_params=pltpu.CompilerParams(dimension_semantics=("parallel",)),
    )(xy, x_t, packed["encw"], packed["encb"], packed["awh"], packed["abh"],
      packed["aw5"], packed["ab5"], packed["wtx"], packed["wth"], packed["bvd"],
      packed["taus"])

    mu = out[..., :y_dim]
    std = out[..., y_dim:2 * y_dim]
    return mu, std


# ---------------------------------------------------------------------------
# Deterministic parameter init (kaiming-normal fan_in + small-normal bias)
# ---------------------------------------------------------------------------
def _init_linear(key, in_f, out_f, w_std=None, b_std=1e-3):
    kw, kb = jax.random.split(key)
    if w_std is None:
        w_std = math.sqrt(2.0 / in_f)                           # kaiming normal, relu
    w = jax.random.normal(kw, (out_f, in_f), jnp.float32) * w_std
    b = jax.random.normal(kb, (1, out_f), jnp.float32) * b_std
    return w.T, b                                               # store (in, out)


def init_params(key, x_dim, y_dim, r_dim, h_dim):
    keys = jax.random.split(key, 64)
    ki = iter(keys)
    enc_dims = [(x_dim + y_dim, h_dim)] + [(h_dim, h_dim)] * 4 + [(h_dim, r_dim)]
    encoder = [_init_linear(next(ki), i, o) for i, o in enc_dims]

    def vd_layer(in_f, out_f):
        total = in_f + out_f + 1 + out_f
        alpha_dims = [(r_dim, r_dim)] * 4 + [(r_dim, total)]
        alpha_net = [_init_linear(next(ki), i, o) for i, o in alpha_dims]
        bound = 1.0 / math.sqrt(in_f)                           # nn.Linear default init
        wt = jax.random.uniform(next(ki), (in_f, out_f), jnp.float32, -bound, bound)
        b = jax.random.uniform(next(ki), (1, out_f), jnp.float32, -bound, bound)
        tau = jnp.full((1, 1), 1.5, jnp.float32)
        return {"alpha_net": alpha_net, "Wt": wt, "b": b, "tau": tau}

    input_dim = x_dim + r_dim
    output_dim = 2 * y_dim
    return {
        "encoder": encoder,
        "g1": vd_layer(input_dim, h_dim),
        "g2": vd_layer(h_dim, h_dim),
        "g3": vd_layer(h_dim, h_dim),
        "g4": vd_layer(h_dim, output_dim),
    }


# ---------------------------------------------------------------------------
# Pure-JAX reference (for correctness check)
# ---------------------------------------------------------------------------
def _ref_vd(x, r, layer, *, alpha, apply_relu):
    h = r[:, 0, :]
    for wt, c in layer["alpha_net"][:4]:
        h = h @ wt + c
        h = jnp.where(h > 0, h, 0.1 * h)
    wt5, c5 = layer["alpha_net"][4]
    la = h @ wt5 + c5
    tau = jnp.clip(layer["tau"][0, 0], 0.5, 5.0)
    la = jnp.clip(la, alpha, 2.5) / tau
    in_f, out_f = layer["Wt"].shape
    s1 = jax.nn.sigmoid(la[:, :in_f])
    s2 = jax.nn.sigmoid(la[:, in_f:in_f + out_f])
    s3 = jax.nn.sigmoid(la[:, in_f + out_f:in_f + out_f + 1])
    pb = jax.nn.sigmoid(la[:, in_f + out_f + 1:])
    p = s2[:, :, None] * s1[:, None, :] * s3[:, :, None]        # (B, out, in)
    W = layer["Wt"].T                                           # (out, in)
    w_mean = (1.0 - p) * W[None]
    b_mean = (1.0 - pb) * layer["b"]                            # (B, out)
    out = jnp.einsum("bni,boi->bno", x, w_mean) + b_mean[:, None, :]
    if apply_relu:
        out = jnp.maximum(out, 0.0)
    return out


def _ref_forward(params, x_c, y_c, x_t, *, alpha):
    xy = jnp.concatenate([x_c, y_c], axis=2)
    h = xy
    for wt, c in params["encoder"][:5]:
        h = jnp.maximum(h @ wt + c, 0.0)
    wt6, c6 = params["encoder"][5]
    r = jnp.mean(h @ wt6 + c6, axis=1, keepdims=True)
    B, Nt, _ = x_t.shape
    concat = jnp.concatenate([x_t, jnp.broadcast_to(r, (B, Nt, r.shape[-1]))], -1)
    out = _ref_vd(concat, r, params["g1"], alpha=alpha, apply_relu=True)
    out = _ref_vd(out, r, params["g2"], alpha=alpha, apply_relu=True)
    out = _ref_vd(out, r, params["g3"], alpha=alpha, apply_relu=True)
    out = _ref_vd(out, r, params["g4"], alpha=alpha, apply_relu=False)
    y_dim = out.shape[-1] // 2
    mu, logstd = out[..., :y_dim], out[..., y_dim:]
    return mu, 0.1 + 0.9 * jax.nn.softplus(logstd)


# ---------------------------------------------------------------------------
if __name__ == "__main__":
    x_dim, y_dim, r_dim, h_dim = 1, 1, 32, 32
    alpha = -1.0
    B, Nc, Nt = 2, 8, 8

    key = jax.random.PRNGKey(0)
    kp, kx, ky, kt = jax.random.split(key, 4)
    params = init_params(kp, x_dim, y_dim, r_dim, h_dim)
    packed = pack_params(params, x_dim=x_dim)
    x_c = jax.random.normal(kx, (B, Nc, x_dim), jnp.float32)
    y_c = jax.random.normal(ky, (B, Nc, y_dim), jnp.float32)
    x_t = jax.random.normal(kt, (B, Nt, x_dim), jnp.float32)

    mu, std = model_nvdp_forward(packed, x_c, y_c, x_t, alpha=alpha)
    jax.block_until_ready((mu, std))

    with jax.default_matmul_precision("highest"):
        mu_ref, std_ref = _ref_forward(params, x_c, y_c, x_t, alpha=alpha)
    assert mu.shape == (B, Nt, y_dim) and std.shape == (B, Nt, y_dim)
    assert jnp.allclose(mu, mu_ref, rtol=1e-3, atol=1e-3)
    assert jnp.allclose(std, std_ref, rtol=1e-3, atol=1e-3)
    print("KERNEL_OK")
</pallas_src>

<mosaic_0001>
module attributes {stable_mosaic.version = 11 : i64} {
  func.func @_nvdp_fused_kernel(%arg0: i32, %arg1: memref<1x8x2xf32, #tpu.memory_space<vmem>>, %arg2: memref<1x8x1xf32, #tpu.memory_space<vmem>>, %arg3: memref<6x32x32xf32, #tpu.memory_space<vmem>>, %arg4: memref<6x1x32xf32, #tpu.memory_space<vmem>>, %arg5: memref<16x32x32xf32, #tpu.memory_space<vmem>>, %arg6: memref<16x1x32xf32, #tpu.memory_space<vmem>>, %arg7: memref<4x32x98xf32, #tpu.memory_space<vmem>>, %arg8: memref<4x1x98xf32, #tpu.memory_space<vmem>>, %arg9: memref<1x32xf32, #tpu.memory_space<vmem>>, %arg10: memref<4x32x32xf32, #tpu.memory_space<vmem>>, %arg11: memref<4x1x32xf32, #tpu.memory_space<vmem>>, %arg12: memref<4xf32, #tpu.memory_space<smem>>, %arg13: memref<1x8x128xf32, #tpu.memory_space<vmem>>) attributes {dimension_semantics = [#tpu.dimension_semantics<parallel>], iteration_bounds = array<i64: 2>, scalar_prefetch = 0 : i64, scratch_operands = 0 : i64, tpu.core_type = #tpu.core_type<tc>, window_params = [{transform_indices = @transform_0, window_bounds = array<i64: 1, 8, 2>}, {transform_indices = @transform_1, window_bounds = array<i64: 1, 8, 1>}, {pipeline_mode = #tpu.pipeline_mode<synchronous>, transform_indices = @transform_2, window_bounds = array<i64: 6, 32, 32>}, {pipeline_mode = #tpu.pipeline_mode<synchronous>, transform_indices = @transform_3, window_bounds = array<i64: 6, 1, 32>}, {pipeline_mode = #tpu.pipeline_mode<synchronous>, transform_indices = @transform_4, window_bounds = array<i64: 16, 32, 32>}, {pipeline_mode = #tpu.pipeline_mode<synchronous>, transform_indices = @transform_5, window_bounds = array<i64: 16, 1, 32>}, {pipeline_mode = #tpu.pipeline_mode<synchronous>, transform_indices = @transform_6, window_bounds = array<i64: 4, 32, 98>}, {pipeline_mode = #tpu.pipeline_mode<synchronous>, transform_indices = @transform_7, window_bounds = array<i64: 4, 1, 98>}, {pipeline_mode = #tpu.pipeline_mode<synchronous>, transform_indices = @transform_8, window_bounds = array<i64: 1, 32>}, {pipeline_mode = #tpu.pipeline_mode<synchronous>, transform_indices = @transform_9, window_bounds = array<i64: 4, 32, 32>}, {pipeline_mode = #tpu.pipeline_mode<synchronous>, transform_indices = @transform_10, window_bounds = array<i64: 4, 1, 32>}, {transform_indices = @transform_11, window_bounds = array<i64: 4>}, {transform_indices = @transform_12, window_bounds = array<i64: 1, 8, 128>}]} {
    %c0 = arith.constant 0 : index
    %c0_0 = arith.constant 0 : index
    %c0_1 = arith.constant 0 : index
    %0 = vector.load %arg1[%c0, %c0_0, %c0_1] : memref<1x8x2xf32, #tpu.memory_space<vmem>>, vector<1x8x2xf32>
    %1 = vector.shape_cast %0 : vector<1x8x2xf32> to vector<8x2xf32>
    %c0_2 = arith.constant 0 : index
    %c0_3 = arith.constant 0 : index
    %c0_4 = arith.constant 0 : index
    %2 = vector.load %arg3[%c0_2, %c0_3, %c0_4] : memref<6x32x32xf32, #tpu.memory_space<vmem>>, vector<1x2x32xf32>
    %3 = vector.shape_cast %2 : vector<1x2x32xf32> to vector<2x32xf32>
    %c0_5 = arith.constant 0 : index
    %c0_6 = arith.constant 0 : index
    %c0_7 = arith.constant 0 : index
    %4 = vector.load %arg4[%c0_5, %c0_6, %c0_7] : memref<6x1x32xf32, #tpu.memory_space<vmem>>, vector<1x1x32xf32>
    %5 = vector.shape_cast %4 : vector<1x1x32xf32> to vector<1x32xf32>
    %cst = arith.constant dense<0.000000e+00> : vector<8x32xf32>
    %6 = tpu.matmul %1, %3, %cst {dimension_numbers = #tpu.dot_dimension_numbers<[1], [0], [0], [1], [0, 0, 1, 1], [], []>} : vector<8x2xf32>, vector<2x32xf32>, vector<8x32xf32> -> vector<8x32xf32>
    %7 = vector.broadcast %5 : vector<1x32xf32> to vector<8x32xf32>
    %8 = arith.addf %6, %7 : vector<8x32xf32>
    %cst_8 = arith.constant 0.000000e+00 : f32
    %9 = vector.broadcast %cst_8 : f32 to vector<8x32xf32>
    %10 = arith.maximumf %8, %9 : vector<8x32xf32>
    %c1 = arith.constant 1 : index
    %c0_9 = arith.constant 0 : index
    %c0_10 = arith.constant 0 : index
    %11 = vector.load %arg3[%c1, %c0_9, %c0_10] : memref<6x32x32xf32, #tpu.memory_space<vmem>>, vector<1x32x32xf32>
    %12 = vector.shape_cast %11 : vector<1x32x32xf32> to vector<32x32xf32>
    %c1_11 = arith.constant 1 : index
    %c0_12 = arith.constant 0 : index
    %c0_13 = arith.constant 0 : index
    %13 = vector.load %arg4[%c1_11, %c0_12, %c0_13] : memref<6x1x32xf32, #tpu.memory_space<vmem>>, vector<1x1x32xf32>
    %14 = vector.shape_cast %13 : vector<1x1x32xf32> to vector<1x32xf32>
    %cst_14 = arith.constant dense<0.000000e+00> : vector<8x32xf32>
    %15 = tpu.matmul %10, %12, %cst_14 {dimension_numbers = #tpu.dot_dimension_numbers<[1], [0], [0], [1], [0, 0, 1, 1], [], []>} : vector<8x32xf32>, vector<32x32xf32>, vector<8x32xf32> -> vector<8x32xf32>
    %16 = vector.broadcast %14 : vector<1x32xf32> to vector<8x32xf32>
    %17 = arith.addf %15, %16 : vector<8x32xf32>
    %cst_15 = arith.constant 0.000000e+00 : f32
    %18 = vector.broadcast %cst_15 : f32 to vector<8x32xf32>
    %19 = arith.maximumf %17, %18 : vector<8x32xf32>
    %c2 = arith.constant 2 : index
    %c0_16 = arith.constant 0 : index
    %c0_17 = arith.constant 0 : index
    %20 = vector.load %arg3[%c2, %c0_16, %c0_17] : memref<6x32x32xf32, #tpu.memory_space<vmem>>, vector<1x32x32xf32>
    %21 = vector.shape_cast %20 : vector<1x32x32xf32> to vector<32x32xf32>
    %c2_18 = arith.constant 2 : index
    %c0_19 = arith.constant 0 : index
    %c0_20 = arith.constant 0 : index
    %22 = vector.load %arg4[%c2_18, %c0_19, %c0_20] : memref<6x1x32xf32, #tpu.memory_space<vmem>>, vector<1x1x32xf32>
    %23 = vector.shape_cast %22 : vector<1x1x32xf32> to vector<1x32xf32>
    %cst_21 = arith.constant dense<0.000000e+00> : vector<8x32xf32>
    %24 = tpu.matmul %19, %21, %cst_21 {dimension_numbers = #tpu.dot_dimension_numbers<[1], [0], [0], [1], [0, 0, 1, 1], [], []>} : vector<8x32xf32>, vector<32x32xf32>, vector<8x32xf32> -> vector<8x32xf32>
    %25 = vector.broadcast %23 : vector<1x32xf32> to vector<8x32xf32>
    %26 = arith.addf %24, %25 : vector<8x32xf32>
    %cst_22 = arith.constant 0.000000e+00 : f32
    %27 = vector.broadcast %cst_22 : f32 to vector<8x32xf32>
    %28 = arith.maximumf %26, %27 : vector<8x32xf32>
    %c3 = arith.constant 3 : index
    %c0_23 = arith.constant 0 : index
    %c0_24 = arith.constant 0 : index
    %29 = vector.load %arg3[%c3, %c0_23, %c0_24] : memref<6x32x32xf32, #tpu.memory_space<vmem>>, vector<1x32x32xf32>
    %30 = vector.shape_cast %29 : vector<1x32x32xf32> to vector<32x32xf32>
    %c3_25 = arith.constant 3 : index
    %c0_26 = arith.constant 0 : index
    %c0_27 = arith.constant 0 : index
    %31 = vector.load %arg4[%c3_25, %c0_26, %c0_27] : memref<6x1x32xf32, #tpu.memory_space<vmem>>, vector<1x1x32xf32>
    %32 = vector.shape_cast %31 : vector<1x1x32xf32> to vector<1x32xf32>
    %cst_28 = arith.constant dense<0.000000e+00> : vector<8x32xf32>
    %33 = tpu.matmul %28, %30, %cst_28 {dimension_numbers = #tpu.dot_dimension_numbers<[1], [0], [0], [1], [0, 0, 1, 1], [], []>} : vector<8x32xf32>, vector<32x32xf32>, vector<8x32xf32> -> vector<8x32xf32>
    %34 = vector.broadcast %32 : vector<1x32xf32> to vector<8x32xf32>
    %35 = arith.addf %33, %34 : vector<8x32xf32>
    %cst_29 = arith.constant 0.000000e+00 : f32
    %36 = vector.broadcast %cst_29 : f32 to vector<8x32xf32>
    %37 = arith.maximumf %35, %36 : vector<8x32xf32>
    %c4 = arith.constant 4 : index
    %c0_30 = arith.constant 0 : index
    %c0_31 = arith.constant 0 : index
    %38 = vector.load %arg3[%c4, %c0_30, %c0_31] : memref<6x32x32xf32, #tpu.memory_space<vmem>>, vector<1x32x32xf32>
    %39 = vector.shape_cast %38 : vector<1x32x32xf32> to vector<32x32xf32>
    %c4_32 = arith.constant 4 : index
    %c0_33 = arith.constant 0 : index
    %c0_34 = arith.constant 0 : index
    %40 = vector.load %arg4[%c4_32, %c0_33, %c0_34] : memref<6x1x32xf32, #tpu.memory_space<vmem>>, vector<1x1x32xf32>
    %41 = vector.shape_cast %40 : vector<1x1x32xf32> to vector<1x32xf32>
    %cst_35 = arith.constant dense<0.000000e+00> : vector<8x32xf32>
    %42 = tpu.matmul %37, %39, %cst_35 {dimension_numbers = #tpu.dot_dimension_numbers<[1], [0], [0], [1], [0, 0, 1, 1], [], []>} : vector<8x32xf32>, vector<32x32xf32>, vector<8x32xf32> -> vector<8x32xf32>
    %43 = vector.broadcast %41 : vector<1x32xf32> to vector<8x32xf32>
    %44 = arith.addf %42, %43 : vector<8x32xf32>
    %cst_36 = arith.constant 0.000000e+00 : f32
    %45 = vector.broadcast %cst_36 : f32 to vector<8x32xf32>
    %46 = arith.maximumf %44, %45 : vector<8x32xf32>
    %c5 = arith.constant 5 : index
    %c0_37 = arith.constant 0 : index
    %c0_38 = arith.constant 0 : index
    %47 = vector.load %arg3[%c5, %c0_37, %c0_38] : memref<6x32x32xf32, #tpu.memory_space<vmem>>, vector<1x32x32xf32>
    %48 = vector.shape_cast %47 : vector<1x32x32xf32> to vector<32x32xf32>
    %c5_39 = arith.constant 5 : index
    %c0_40 = arith.constant 0 : index
    %c0_41 = arith.constant 0 : index
    %49 = vector.load %arg4[%c5_39, %c0_40, %c0_41] : memref<6x1x32xf32, #tpu.memory_space<vmem>>, vector<1x1x32xf32>
    %50 = vector.shape_cast %49 : vector<1x1x32xf32> to vector<1x32xf32>
    %cst_42 = arith.constant dense<0.000000e+00> : vector<8x32xf32>
    %51 = tpu.matmul %46, %48, %cst_42 {dimension_numbers = #tpu.dot_dimension_numbers<[1], [0], [0], [1], [0, 0, 1, 1], [], []>} : vector<8x32xf32>, vector<32x32xf32>, vector<8x32xf32> -> vector<8x32xf32>
    %52 = vector.broadcast %50 : vector<1x32xf32> to vector<8x32xf32>
    %53 = arith.addf %51, %52 : vector<8x32xf32>
    %cst_43 = arith.constant dense<0.000000e+00> : vector<32xf32>
    %54 = vector.multi_reduction <add>, %53, %cst_43 [0] : vector<8x32xf32> to vector<32xf32>
    %55 = vector.shape_cast %54 : vector<32xf32> to vector<1x32xf32>
    %cst_44 = arith.constant 8.000000e+00 : f32
    %56 = vector.broadcast %cst_44 : f32 to vector<1x32xf32>
    %57 = arith.divf %55, %56 : vector<1x32xf32>
    %c0_45 = arith.constant 0 : index
    %c0_46 = arith.constant 0 : index
    %c0_47 = arith.constant 0 : index
    %58 = vector.load %arg2[%c0_45, %c0_46, %c0_47] : memref<1x8x1xf32, #tpu.memory_space<vmem>>, vector<1x8x1xf32>
    %59 = vector.shape_cast %58 : vector<1x8x1xf32> to vector<8x1xf32>
    %c0_48 = arith.constant 0 : index
    %c0_49 = arith.constant 0 : index
    %c0_50 = arith.constant 0 : index
    %60 = vector.load %arg5[%c0_48, %c0_49, %c0_50] : memref<16x32x32xf32, #tpu.memory_space<vmem>>, vector<1x32x32xf32>
    %61 = vector.shape_cast %60 : vector<1x32x32xf32> to vector<32x32xf32>
    %cst_51 = arith.constant dense<0.000000e+00> : vector<1x32xf32>
    %62 = tpu.matmul %57, %61, %cst_51 {dimension_numbers = #tpu.dot_dimension_numbers<[1], [0], [0], [1], [0, 0, 1, 1], [], []>} : vector<1x32xf32>, vector<32x32xf32>, vector<1x32xf32> -> vector<1x32xf32>
    %c0_52 = arith.constant 0 : index
    %c0_53 = arith.constant 0 : index
    %c0_54 = arith.constant 0 : index
    %63 = vector.load %arg6[%c0_52, %c0_53, %c0_54] : memref<16x1x32xf32, #tpu.memory_space<vmem>>, vector<1x1x32xf32>
    %64 = vector.shape_cast %63 : vector<1x1x32xf32> to vector<1x32xf32>
    %65 = arith.addf %62, %64 : vector<1x32xf32>
    %cst_55 = arith.constant 0.000000e+00 : f32
    %66 = vector.broadcast %cst_55 : f32 to vector<1x32xf32>
    %67 = arith.cmpf ogt, %65, %66 : vector<1x32xf32>
    %cst_56 = arith.constant 1.000000e-01 : f32
    %68 = vector.broadcast %cst_56 : f32 to vector<1x32xf32>
    %69 = arith.mulf %68, %65 : vector<1x32xf32>
    %70 = arith.select %67, %65, %69 : vector<1x32xi1>, vector<1x32xf32>
    %c1_57 = arith.constant 1 : index
    %c0_58 = arith.constant 0 : index
    %c0_59 = arith.constant 0 : index
    %71 = vector.load %arg5[%c1_57, %c0_58, %c0_59] : memref<16x32x32xf32, #tpu.memory_space<vmem>>, vector<1x32x32xf32>
    %72 = vector.shape_cast %71 : vector<1x32x32xf32> to vector<32x32xf32>
    %cst_60 = arith.constant dense<0.000000e+00> : vector<1x32xf32>
    %73 = tpu.matmul %70, %72, %cst_60 {dimension_numbers = #tpu.dot_dimension_numbers<[1], [0], [0], [1], [0, 0, 1, 1], [], []>} : vector<1x32xf32>, vector<32x32xf32>, vector<1x32xf32> -> vector<1x32xf32>
    %c1_61 = arith.constant 1 : index
    %c0_62 = arith.constant 0 : index
    %c0_63 = arith.constant 0 : index
    %74 = vector.load %arg6[%c1_61, %c0_62, %c0_63] : memref<16x1x32xf32, #tpu.memory_space<vmem>>, vector<1x1x32xf32>
    %75 = vector.shape_cast %74 : vector<1x1x32xf32> to vector<1x32xf32>
    %76 = arith.addf %73, %75 : vector<1x32xf32>
    %cst_64 = arith.constant 0.000000e+00 : f32
    %77 = vector.broadcast %cst_64 : f32 to vector<1x32xf32>
    %78 = arith.cmpf ogt, %76, %77 : vector<1x32xf32>
    %cst_65 = arith.constant 1.000000e-01 : f32
    %79 = vector.broadcast %cst_65 : f32 to vector<1x32xf32>
    %80 = arith.mulf %79, %76 : vector<1x32xf32>
    %81 = arith.select %78, %76, %80 : vector<1x32xi1>, vector<1x32xf32>
    %c2_66 = arith.constant 2 : index
    %c0_67 = arith.constant 0 : index
    %c0_68 = arith.constant 0 : index
    %82 = vector.load %arg5[%c2_66, %c0_67, %c0_68] : memref<16x32x32xf32, #tpu.memory_space<vmem>>, vector<1x32x32xf32>
    %83 = vector.shape_cast %82 : vector<1x32x32xf32> to vector<32x32xf32>
    %cst_69 = arith.constant dense<0.000000e+00> : vector<1x32xf32>
    %84 = tpu.matmul %81, %83, %cst_69 {dimension_numbers = #tpu.dot_dimension_numbers<[1], [0], [0], [1], [0, 0, 1, 1], [], []>} : vector<1x32xf32>, vector<32x32xf32>, vector<1x32xf32> -> vector<1x32xf32>
    %c2_70 = arith.constant 2 : index
    %c0_71 = arith.constant 0 : index
    %c0_72 = arith.constant 0 : index
    %85 = vector.load %arg6[%c2_70, %c0_71, %c0_72] : memref<16x1x32xf32, #tpu.memory_space<vmem>>, vector<1x1x32xf32>
    %86 = vector.shape_cast %85 : vector<1x1x32xf32> to vector<1x32xf32>
    %87 = arith.addf %84, %86 : vector<1x32xf32>
    %cst_73 = arith.constant 0.000000e+00 : f32
    %88 = vector.broadcast %cst_73 : f32 to vector<1x32xf32>
    %89 = arith.cmpf ogt, %87, %88 : vector<1x32xf32>
    %cst_74 = arith.constant 1.000000e-01 : f32
    %90 = vector.broadcast %cst_74 : f32 to vector<1x32xf32>
    %91 = arith.mulf %90, %87 : vector<1x32xf32>
    %92 = arith.select %89, %87, %91 : vector<1x32xi1>, vector<1x32xf32>
    %c3_75 = arith.constant 3 : index
    %c0_76 = arith.constant 0 : index
    %c0_77 = arith.constant 0 : index
    %93 = vector.load %arg5[%c3_75, %c0_76, %c0_77] : memref<16x32x32xf32, #tpu.memory_space<vmem>>, vector<1x32x32xf32>
    %94 = vector.shape_cast %93 : vector<1x32x32xf32> to vector<32x32xf32>
    %cst_78 = arith.constant dense<0.000000e+00> : vector<1x32xf32>
    %95 = tpu.matmul %92, %94, %cst_78 {dimension_numbers = #tpu.dot_dimension_numbers<[1], [0], [0], [1], [0, 0, 1, 1], [], []>} : vector<1x32xf32>, vector<32x32xf32>, vector<1x32xf32> -> vector<1x32xf32>
    %c3_79 = arith.constant 3 : index
    %c0_80 = arith.constant 0 : index
    %c0_81 = arith.constant 0 : index
    %96 = vector.load %arg6[%c3_79, %c0_80, %c0_81] : memref<16x1x32xf32, #tpu.memory_space<vmem>>, vector<1x1x32xf32>
    %97 = vector.shape_cast %96 : vector<1x1x32xf32> to vector<1x32xf32>
    %98 = arith.addf %95, %97 : vector<1x32xf32>
    %cst_82 = arith.constant 0.000000e+00 : f32
    %99 = vector.broadcast %cst_82 : f32 to vector<1x32xf32>
    %100 = arith.cmpf ogt, %98, %99 : vector<1x32xf32>
    %cst_83 = arith.constant 1.000000e-01 : f32
    %101 = vector.broadcast %cst_83 : f32 to vector<1x32xf32>
    %102 = arith.mulf %101, %98 : vector<1x32xf32>
    %103 = arith.select %100, %98, %102 : vector<1x32xi1>, vector<1x32xf32>
    %c0_84 = arith.constant 0 : index
    %c0_85 = arith.constant 0 : index
    %c0_86 = arith.constant 0 : index
    %104 = vector.load %arg7[%c0_84, %c0_85, %c0_86] : memref<4x32x98xf32, #tpu.memory_space<vmem>>, vector<1x32x98xf32>
    %105 = vector.shape_cast %104 : vector<1x32x98xf32> to vector<32x98xf32>
    %cst_87 = arith.constant dense<0.000000e+00> : vector<1x98xf32>
    %106 = tpu.matmul %103, %105, %cst_87 {dimension_numbers = #tpu.dot_dimension_numbers<[1], [0], [0], [1], [0, 0, 1, 1], [], []>} : vector<1x32xf32>, vector<32x98xf32>, vector<1x98xf32> -> vector<1x98xf32>
    %c0_88 = arith.constant 0 : index
    %c0_89 = arith.constant 0 : index
    %c0_90 = arith.constant 0 : index
    %107 = vector.load %arg8[%c0_88, %c0_89, %c0_90] : memref<4x1x98xf32, #tpu.memory_space<vmem>>, vector<1x1x98xf32>
    %108 = vector.shape_cast %107 : vector<1x1x98xf32> to vector<1x98xf32>
    %109 = arith.addf %106, %108 : vector<1x98xf32>
    %c0_91 = arith.constant 0 : index
    %110 = memref.load %arg12[%c0_91] : memref<4xf32, #tpu.memory_space<smem>>
    %cst_92 = arith.constant 5.000000e-01 : f32
    %cst_93 = arith.constant 5.000000e+00 : f32
    %111 = arith.maximumf %cst_92, %110 : f32
    %112 = arith.minimumf %cst_93, %111 : f32
    %cst_94 = arith.constant -1.000000e+00 : f32
    %cst_95 = arith.constant 2.500000e+00 : f32
    %113 = vector.broadcast %cst_94 : f32 to vector<1x98xf32>
    %114 = arith.maximumf %113, %109 : vector<1x98xf32>
    %115 = vector.broadcast %cst_95 : f32 to vector<1x98xf32>
    %116 = arith.minimumf %115, %114 : vector<1x98xf32>
    %117 = vector.broadcast %112 : f32 to vector<1x98xf32>
    %118 = arith.divf %116, %117 : vector<1x98xf32>
    %119 = vector.extract_strided_slice %118 {offsets = [0, 0], sizes = [1, 33], strides = [1, 1]} : vector<1x98xf32> to vector<1x33xf32>
    %120 = arith.negf %119 : vector<1x33xf32>
    %121 = math.exp %120 : vector<1x33xf32>
    %cst_96 = arith.constant 1.000000e+00 : f32
    %122 = vector.broadcast %cst_96 : f32 to vector<1x33xf32>
    %123 = arith.addf %122, %121 : vector<1x33xf32>
    %124 = arith.divf %122, %123 : vector<1x33xf32>
    %125 = vector.extract_strided_slice %118 {offsets = [0, 33], sizes = [1, 32], strides = [1, 1]} : vector<1x98xf32> to vector<1x32xf32>
    %126 = arith.negf %125 : vector<1x32xf32>
    %127 = math.exp %126 : vector<1x32xf32>
    %cst_97 = arith.constant 1.000000e+00 : f32
    %128 = vector.broadcast %cst_97 : f32 to vector<1x32xf32>
    %129 = arith.addf %128, %127 : vector<1x32xf32>
    %130 = arith.divf %128, %129 : vector<1x32xf32>
    %131 = vector.extract_strided_slice %118 {offsets = [0, 65], sizes = [1, 1], strides = [1, 1]} : vector<1x98xf32> to vector<1x1xf32>
    %132 = arith.negf %131 : vector<1x1xf32>
    %133 = math.exp %132 : vector<1x1xf32>
    %cst_98 = arith.constant 1.000000e+00 : f32
    %134 = vector.broadcast %cst_98 : f32 to vector<1x1xf32>
    %135 = arith.addf %134, %133 : vector<1x1xf32>
    %136 = arith.divf %134, %135 : vector<1x1xf32>
    %137 = vector.extract_strided_slice %118 {offsets = [0, 66], sizes = [1, 32], strides = [1, 1]} : vector<1x98xf32> to vector<1x32xf32>
    %138 = arith.negf %137 : vector<1x32xf32>
    %139 = math.exp %138 : vector<1x32xf32>
    %cst_99 = arith.constant 1.000000e+00 : f32
    %140 = vector.broadcast %cst_99 : f32 to vector<1x32xf32>
    %141 = arith.addf %140, %139 : vector<1x32xf32>
    %142 = arith.divf %140, %141 : vector<1x32xf32>
    %c0_100 = arith.constant 0 : index
    %c0_101 = arith.constant 0 : index
    %c0_102 = arith.constant 0 : index
    %143 = vector.load %arg11[%c0_100, %c0_101, %c0_102] : memref<4x1x32xf32, #tpu.memory_space<vmem>>, vector<1x1x32xf32>
    %144 = vector.shape_cast %143 : vector<1x1x32xf32> to vector<1x32xf32>
    %145 = vector.broadcast %136 : vector<1x1xf32> to vector<1x32xf32>
    %146 = arith.mulf %145, %130 : vector<1x32xf32>
    %147 = vector.extract_strided_slice %124 {offsets = [0, 0], sizes = [1, 1], strides = [1, 1]} : vector<1x33xf32> to vector<1x1xf32>
    %148 = vector.extract_strided_slice %124 {offsets = [0, 1], sizes = [1, 32], strides = [1, 1]} : vector<1x33xf32> to vector<1x32xf32>
    %c0_103 = arith.constant 0 : index
    %c0_104 = arith.constant 0 : index
    %149 = vector.load %arg9[%c0_103, %c0_104] : memref<1x32xf32, #tpu.memory_space<vmem>>, vector<1x32xf32>
    %c0_105 = arith.constant 0 : index
    %c0_106 = arith.constant 0 : index
    %c0_107 = arith.constant 0 : index
    %150 = vector.load %arg10[%c0_105, %c0_106, %c0_107] : memref<4x32x32xf32, #tpu.memory_space<vmem>>, vector<1x32x32xf32>
    %151 = vector.shape_cast %150 : vector<1x32x32xf32> to vector<32x32xf32>
    %152 = vector.broadcast %147 : vector<1x1xf32> to vector<8x1xf32>
    %153 = arith.mulf %59, %152 : vector<8x1xf32>
    %154 = tpu.concatenate %59, %153 in 0 : vector<8x1xf32>, vector<8x1xf32> -> vector<16x1xf32>
    %cst_108 = arith.constant dense<0.000000e+00> : vector<16x32xf32>
    %155 = tpu.matmul %154, %149, %cst_108 {dimension_numbers = #tpu.dot_dimension_numbers<[1], [0], [0], [1], [0, 0, 1, 1], [], []>} : vector<16x1xf32>, vector<1x32xf32>, vector<16x32xf32> -> vector<16x32xf32>
    %cst_109 = arith.constant dense<0.000000e+00> : vector<1x32xf32>
    %156 = tpu.matmul %57, %151, %cst_109 {dimension_numbers = #tpu.dot_dimension_numbers<[1], [0], [0], [1], [0, 0, 1, 1], [], []>} : vector<1x32xf32>, vector<32x32xf32>, vector<1x32xf32> -> vector<1x32xf32>
    %157 = arith.mulf %57, %148 : vector<1x32xf32>
    %cst_110 = arith.constant dense<0.000000e+00> : vector<1x32xf32>
    %158 = tpu.matmul %157, %151, %cst_110 {dimension_numbers = #tpu.dot_dimension_numbers<[1], [0], [0], [1], [0, 0, 1, 1], [], []>} : vector<1x32xf32>, vector<32x32xf32>, vector<1x32xf32> -> vector<1x32xf32>
    %159 = vector.extract_strided_slice %155 {offsets = [0, 0], sizes = [8, 32], strides = [1, 1]} : vector<16x32xf32> to vector<8x32xf32>
    %160 = vector.broadcast %156 : vector<1x32xf32> to vector<8x32xf32>
    %161 = arith.addf %159, %160 : vector<8x32xf32>
    %162 = vector.extract_strided_slice %155 {offsets = [8, 0], sizes = [8, 32], strides = [1, 1]} : vector<16x32xf32> to vector<8x32xf32>
    %163 = vector.broadcast %158 : vector<1x32xf32> to vector<8x32xf32>
    %164 = arith.addf %162, %163 : vector<8x32xf32>
    %165 = vector.broadcast %146 : vector<1x32xf32> to vector<8x32xf32>
    %166 = arith.mulf %165, %164 : vector<8x32xf32>
    %167 = arith.subf %161, %166 : vector<8x32xf32>
    %cst_111 = arith.constant 1.000000e+00 : f32
    %168 = vector.broadcast %cst_111 : f32 to vector<1x32xf32>
    %169 = arith.subf %168, %142 : vector<1x32xf32>
    %170 = arith.mulf %169, %144 : vector<1x32xf32>
    %171 = vector.broadcast %170 : vector<1x32xf32> to vector<8x32xf32>
    %172 = arith.addf %167, %171 : vector<8x32xf32>
    %cst_112 = arith.constant 0.000000e+00 : f32
    %173 = vector.broadcast %cst_112 : f32 to vector<8x32xf32>
    %174 = arith.maximumf %172, %173 : vector<8x32xf32>
    %c4_113 = arith.constant 4 : index
    %c0_114 = arith.constant 0 : index
    %c0_115 = arith.constant 0 : index
    %175 = vector.load %arg5[%c4_113, %c0_114, %c0_115] : memref<16x32x32xf32, #tpu.memory_space<vmem>>, vector<1x32x32xf32>
    %176 = vector.shape_cast %175 : vector<1x32x32xf32> to vector<32x32xf32>
    %cst_116 = arith.constant dense<0.000000e+00> : vector<1x32xf32>
    %177 = tpu.matmul %57, %176, %cst_116 {dimension_numbers = #tpu.dot_dimension_numbers<[1], [0], [0], [1], [0, 0, 1, 1], [], []>} : vector<1x32xf32>, vector<32x32xf32>, vector<1x32xf32> -> vector<1x32xf32>
    %c4_117 = arith.constant 4 : index
    %c0_118 = arith.constant 0 : index
    %c0_119 = arith.constant 0 : index
    %178 = vector.load %arg6[%c4_117, %c0_118, %c0_119] : memref<16x1x32xf32, #tpu.memory_space<vmem>>, vector<1x1x32xf32>
    %179 = vector.shape_cast %178 : vector<1x1x32xf32> to vector<1x32xf32>
    %180 = arith.addf %177, %179 : vector<1x32xf32>
    %cst_120 = arith.constant 0.000000e+00 : f32
    %181 = vector.broadcast %cst_120 : f32 to vector<1x32xf32>
    %182 = arith.cmpf ogt, %180, %181 : vector<1x32xf32>
    %cst_121 = arith.constant 1.000000e-01 : f32
    %183 = vector.broadcast %cst_121 : f32 to vector<1x32xf32>
    %184 = arith.mulf %183, %180 : vector<1x32xf32>
    %185 = arith.select %182, %180, %184 : vector<1x32xi1>, vector<1x32xf32>
    %c5_122 = arith.constant 5 : index
    %c0_123 = arith.constant 0 : index
    %c0_124 = arith.constant 0 : index
    %186 = vector.load %arg5[%c5_122, %c0_123, %c0_124] : memref<16x32x32xf32, #tpu.memory_space<vmem>>, vector<1x32x32xf32>
    %187 = vector.shape_cast %186 : vector<1x32x32xf32> to vector<32x32xf32>
    %cst_125 = arith.constant dense<0.000000e+00> : vector<1x32xf32>
    %188 = tpu.matmul %185, %187, %cst_125 {dimension_numbers = #tpu.dot_dimension_numbers<[1], [0], [0], [1], [0, 0, 1, 1], [], []>} : vector<1x32xf32>, vector<32x32xf32>, vector<1x32xf32> -> vector<1x32xf32>
    %c5_126 = arith.constant 5 : index
    %c0_127 = arith.constant 0 : index
    %c0_128 = arith.constant 0 : index
    %189 = vector.load %arg6[%c5_126, %c0_127, %c0_128] : memref<16x1x32xf32, #tpu.memory_space<vmem>>, vector<1x1x32xf32>
    %190 = vector.shape_cast %189 : vector<1x1x32xf32> to vector<1x32xf32>
    %191 = arith.addf %188, %190 : vector<1x32xf32>
    %cst_129 = arith.constant 0.000000e+00 : f32
    %192 = vector.broadcast %cst_129 : f32 to vector<1x32xf32>
    %193 = arith.cmpf ogt, %191, %192 : vector<1x32xf32>
    %cst_130 = arith.constant 1.000000e-01 : f32
    %194 = vector.broadcast %cst_130 : f32 to vector<1x32xf32>
    %195 = arith.mulf %194, %191 : vector<1x32xf32>
    %196 = arith.select %193, %191, %195 : vector<1x32xi1>, vector<1x32xf32>
    %c6 = arith.constant 6 : index
    %c0_131 = arith.constant 0 : index
    %c0_132 = arith.constant 0 : index
    %197 = vector.load %arg5[%c6, %c0_131, %c0_132] : memref<16x32x32xf32, #tpu.memory_space<vmem>>, vector<1x32x32xf32>
    %198 = vector.shape_cast %197 : vector<1x32x32xf32> to vector<32x32xf32>
    %cst_133 = arith.constant dense<0.000000e+00> : vector<1x32xf32>
    %199 = tpu.matmul %196, %198, %cst_133 {dimension_numbers = #tpu.dot_dimension_numbers<[1], [0], [0], [1], [0, 0, 1, 1], [], []>} : vector<1x32xf32>, vector<32x32xf32>, vector<1x32xf32> -> vector<1x32xf32>
    %c6_134 = arith.constant 6 : index
    %c0_135 = arith.constant 0 : index
    %c0_136 = arith.constant 0 : index
    %200 = vector.load %arg6[%c6_134, %c0_135, %c0_136] : memref<16x1x32xf32, #tpu.memory_space<vmem>>, vector<1x1x32xf32>
    %201 = vector.shape_cast %200 : vector<1x1x32xf32> to vector<1x32xf32>
    %202 = arith.addf %199, %201 : vector<1x32xf32>
    %cst_137 = arith.constant 0.000000e+00 : f32
    %203 = vector.broadcast %cst_137 : f32 to vector<1x32xf32>
    %204 = arith.cmpf ogt, %202, %203 : vector<1x32xf32>
    %cst_138 = arith.constant 1.000000e-01 : f32
    %205 = vector.broadcast %cst_138 : f32 to vector<1x32xf32>
    %206 = arith.mulf %205, %202 : vector<1x32xf32>
    %207 = arith.select %204, %202, %206 : vector<1x32xi1>, vector<1x32xf32>
    %c7 = arith.constant 7 : index
    %c0_139 = arith.constant 0 : index
    %c0_140 = arith.constant 0 : index
    %208 = vector.load %arg5[%c7, %c0_139, %c0_140] : memref<16x32x32xf32, #tpu.memory_space<vmem>>, vector<1x32x32xf32>
    %209 = vector.shape_cast %208 : vector<1x32x32xf32> to vector<32x32xf32>
    %cst_141 = arith.constant dense<0.000000e+00> : vector<1x32xf32>
    %210 = tpu.matmul %207, %209, %cst_141 {dimension_numbers = #tpu.dot_dimension_numbers<[1], [0], [0], [1], [0, 0, 1, 1], [], []>} : vector<1x32xf32>, vector<32x32xf32>, vector<1x32xf32> -> vector<1x32xf32>
    %c7_142 = arith.constant 7 : index
    %c0_143 = arith.constant 0 : index
    %c0_144 = arith.constant 0 : index
    %211 = vector.load %arg6[%c7_142, %c0_143, %c0_144] : memref<16x1x32xf32, #tpu.memory_space<vmem>>, vector<1x1x32xf32>
    %212 = vector.shape_cast %211 : vector<1x1x32xf32> to vector<1x32xf32>
    %213 = arith.addf %210, %212 : vector<1x32xf32>
    %cst_145 = arith.constant 0.000000e+00 : f32
    %214 = vector.broadcast %cst_145 : f32 to vector<1x32xf32>
    %215 = arith.cmpf ogt, %213, %214 : vector<1x32xf32>
    %cst_146 = arith.constant 1.000000e-01 : f32
    %216 = vector.broadcast %cst_146 : f32 to vector<1x32xf32>
    %217 = arith.mulf %216, %213 : vector<1x32xf32>
    %218 = arith.select %215, %213, %217 : vector<1x32xi1>, vector<1x32xf32>
    %c1_147 = arith.constant 1 : index
    %c0_148 = arith.constant 0 : index
    %c0_149 = arith.constant 0 : index
    %219 = vector.load %arg7[%c1_147, %c0_148, %c0_149] : memref<4x32x98xf32, #tpu.memory_space<vmem>>, vector<1x32x97xf32>
    %220 = vector.shape_cast %219 : vector<1x32x97xf32> to vector<32x97xf32>
    %cst_150 = arith.constant dense<0.000000e+00> : vector<1x97xf32>
    %221 = tpu.matmul %218, %220, %cst_150 {dimension_numbers = #tpu.dot_dimension_numbers<[1], [0], [0], [1], [0, 0, 1, 1], [], []>} : vector<1x32xf32>, vector<32x97xf32>, vector<1x97xf32> -> vector<1x97xf32>
    %c1_151 = arith.constant 1 : index
    %c0_152 = arith.constant 0 : index
    %c0_153 = arith.constant 0 : index
    %222 = vector.load %arg8[%c1_151, %c0_152, %c0_153] : memref<4x1x98xf32, #tpu.memory_space<vmem>>, vector<1x1x97xf32>
    %223 = vector.shape_cast %222 : vector<1x1x97xf32> to vector<1x97xf32>
    %224 = arith.addf %221, %223 : vector<1x97xf32>
    %c1_154 = arith.constant 1 : index
    %225 = memref.load %arg12[%c1_154] : memref<4xf32, #tpu.memory_space<smem>>
    %cst_155 = arith.constant 5.000000e-01 : f32
    %cst_156 = arith.constant 5.000000e+00 : f32
    %226 = arith.maximumf %cst_155, %225 : f32
    %227 = arith.minimumf %cst_156, %226 : f32
    %cst_157 = arith.constant -1.000000e+00 : f32
    %cst_158 = arith.constant 2.500000e+00 : f32
    %228 = vector.broadcast %cst_157 : f32 to vector<1x97xf32>
    %229 = arith.maximumf %228, %224 : vector<1x97xf32>
    %230 = vector.broadcast %cst_158 : f32 to vector<1x97xf32>
    %231 = arith.minimumf %230, %229 : vector<1x97xf32>
    %232 = vector.broadcast %227 : f32 to vector<1x97xf32>
    %233 = arith.divf %231, %232 : vector<1x97xf32>
    %234 = vector.extract_strided_slice %233 {offsets = [0, 0], sizes = [1, 32], strides = [1, 1]} : vector<1x97xf32> to vector<1x32xf32>
    %235 = arith.negf %234 : vector<1x32xf32>
    %236 = math.exp %235 : vector<1x32xf32>
    %cst_159 = arith.constant 1.000000e+00 : f32
    %237 = vector.broadcast %cst_159 : f32 to vector<1x32xf32>
    %238 = arith.addf %237, %236 : vector<1x32xf32>
    %239 = arith.divf %237, %238 : vector<1x32xf32>
    %240 = vector.extract_strided_slice %233 {offsets = [0, 32], sizes = [1, 32], strides = [1, 1]} : vector<1x97xf32> to vector<1x32xf32>
    %241 = arith.negf %240 : vector<1x32xf32>
    %242 = math.exp %241 : vector<1x32xf32>
    %cst_160 = arith.constant 1.000000e+00 : f32
    %243 = vector.broadcast %cst_160 : f32 to vector<1x32xf32>
    %244 = arith.addf %243, %242 : vector<1x32xf32>
    %245 = arith.divf %243, %244 : vector<1x32xf32>
    %246 = vector.extract_strided_slice %233 {offsets = [0, 64], sizes = [1, 1], strides = [1, 1]} : vector<1x97xf32> to vector<1x1xf32>
    %247 = arith.negf %246 : vector<1x1xf32>
    %248 = math.exp %247 : vector<1x1xf32>
    %cst_161 = arith.constant 1.000000e+00 : f32
    %249 = vector.broadcast %cst_161 : f32 to vector<1x1xf32>
    %250 = arith.addf %249, %248 : vector<1x1xf32>
    %251 = arith.divf %249, %250 : vector<1x1xf32>
    %252 = vector.extract_strided_slice %233 {offsets = [0, 65], sizes = [1, 32], strides = [1, 1]} : vector<1x97xf32> to vector<1x32xf32>
    %253 = arith.negf %252 : vector<1x32xf32>
    %254 = math.exp %253 : vector<1x32xf32>
    %cst_162 = arith.constant 1.000000e+00 : f32
    %255 = vector.broadcast %cst_162 : f32 to vector<1x32xf32>
    %256 = arith.addf %255, %254 : vector<1x32xf32>
    %257 = arith.divf %255, %256 : vector<1x32xf32>
    %c1_163 = arith.constant 1 : index
    %c0_164 = arith.constant 0 : index
    %c0_165 = arith.constant 0 : index
    %258 = vector.load %arg11[%c1_163, %c0_164, %c0_165] : memref<4x1x32xf32, #tpu.memory_space<vmem>>, vector<1x1x32xf32>
    %259 = vector.shape_cast %258 : vector<1x1x32xf32> to vector<1x32xf32>
    %260 = vector.broadcast %251 : vector<1x1xf32> to vector<1x32xf32>
    %261 = arith.mulf %260, %245 : vector<1x32xf32>
    %c1_166 = arith.constant 1 : index
    %c0_167 = arith.constant 0 : index
    %c0_168 = arith.constant 0 : index
    %262 = vector.load %arg10[%c1_166, %c0_167, %c0_168] : memref<4x32x32xf32, #tpu.memory_space<vmem>>, vector<1x32x32xf32>
    %263 = vector.shape_cast %262 : vector<1x32x32xf32> to vector<32x32xf32>
    %264 = vector.broadcast %239 : vector<1x32xf32> to vector<8x32xf32>
    %265 = arith.mulf %174, %264 : vector<8x32xf32>
    %266 = tpu.concatenate %174, %265 in 0 : vector<8x32xf32>, vector<8x32xf32> -> vector<16x32xf32>
    %cst_169 = arith.constant dense<0.000000e+00> : vector<16x32xf32>
    %267 = tpu.matmul %266, %263, %cst_169 {dimension_numbers = #tpu.dot_dimension_numbers<[1], [0], [0], [1], [0, 0, 1, 1], [], []>} : vector<16x32xf32>, vector<32x32xf32>, vector<16x32xf32> -> vector<16x32xf32>
    %268 = vector.extract_strided_slice %267 {offsets = [0, 0], sizes = [8, 32], strides = [1, 1]} : vector<16x32xf32> to vector<8x32xf32>
    %269 = vector.extract_strided_slice %267 {offsets = [8, 0], sizes = [8, 32], strides = [1, 1]} : vector<16x32xf32> to vector<8x32xf32>
    %270 = vector.broadcast %261 : vector<1x32xf32> to vector<8x32xf32>
    %271 = arith.mulf %270, %269 : vector<8x32xf32>
    %272 = arith.subf %268, %271 : vector<8x32xf32>
    %cst_170 = arith.constant 1.000000e+00 : f32
    %273 = vector.broadcast %cst_170 : f32 to vector<1x32xf32>
    %274 = arith.subf %273, %257 : vector<1x32xf32>
    %275 = arith.mulf %274, %259 : vector<1x32xf32>
    %276 = vector.broadcast %275 : vector<1x32xf32> to vector<8x32xf32>
    %277 = arith.addf %272, %276 : vector<8x32xf32>
    %cst_171 = arith.constant 0.000000e+00 : f32
    %278 = vector.broadcast %cst_171 : f32 to vector<8x32xf32>
    %279 = arith.maximumf %277, %278 : vector<8x32xf32>
    %c8 = arith.constant 8 : index
    %c0_172 = arith.constant 0 : index
    %c0_173 = arith.constant 0 : index
    %280 = vector.load %arg5[%c8, %c0_172, %c0_173] : memref<16x32x32xf32, #tpu.memory_space<vmem>>, vector<1x32x32xf32>
    %281 = vector.shape_cast %280 : vector<1x32x32xf32> to vector<32x32xf32>
    %cst_174 = arith.constant dense<0.000000e+00> : vector<1x32xf32>
    %282 = tpu.matmul %57, %281, %cst_174 {dimension_numbers = #tpu.dot_dimension_numbers<[1], [0], [0], [1], [0, 0, 1, 1], [], []>} : vector<1x32xf32>, vector<32x32xf32>, vector<1x32xf32> -> vector<1x32xf32>
    %c8_175 = arith.constant 8 : index
    %c0_176 = arith.constant 0 : index
    %c0_177 = arith.constant 0 : index
    %283 = vector.load %arg6[%c8_175, %c0_176, %c0_177] : memref<16x1x32xf32, #tpu.memory_space<vmem>>, vector<1x1x32xf32>
    %284 = vector.shape_cast %283 : vector<1x1x32xf32> to vector<1x32xf32>
    %285 = arith.addf %282, %284 : vector<1x32xf32>
    %cst_178 = arith.constant 0.000000e+00 : f32
    %286 = vector.broadcast %cst_178 : f32 to vector<1x32xf32>
    %287 = arith.cmpf ogt, %285, %286 : vector<1x32xf32>
    %cst_179 = arith.constant 1.000000e-01 : f32
    %288 = vector.broadcast %cst_179 : f32 to vector<1x32xf32>
    %289 = arith.mulf %288, %285 : vector<1x32xf32>
    %290 = arith.select %287, %285, %289 : vector<1x32xi1>, vector<1x32xf32>
    %c9 = arith.constant 9 : index
    %c0_180 = arith.constant 0 : index
    %c0_181 = arith.constant 0 : index
    %291 = vector.load %arg5[%c9, %c0_180, %c0_181] : memref<16x32x32xf32, #tpu.memory_space<vmem>>, vector<1x32x32xf32>
    %292 = vector.shape_cast %291 : vector<1x32x32xf32> to vector<32x32xf32>
    %cst_182 = arith.constant dense<0.000000e+00> : vector<1x32xf32>
    %293 = tpu.matmul %290, %292, %cst_182 {dimension_numbers = #tpu.dot_dimension_numbers<[1], [0], [0], [1], [0, 0, 1, 1], [], []>} : vector<1x32xf32>, vector<32x32xf32>, vector<1x32xf32> -> vector<1x32xf32>
    %c9_183 = arith.constant 9 : index
    %c0_184 = arith.constant 0 : index
    %c0_185 = arith.constant 0 : index
    %294 = vector.load %arg6[%c9_183, %c0_184, %c0_185] : memref<16x1x32xf32, #tpu.memory_space<vmem>>, vector<1x1x32xf32>
    %295 = vector.shape_cast %294 : vector<1x1x32xf32> to vector<1x32xf32>
    %296 = arith.addf %293, %295 : vector<1x32xf32>
    %cst_186 = arith.constant 0.000000e+00 : f32
    %297 = vector.broadcast %cst_186 : f32 to vector<1x32xf32>
    %298 = arith.cmpf ogt, %296, %297 : vector<1x32xf32>
    %cst_187 = arith.constant 1.000000e-01 : f32
    %299 = vector.broadcast %cst_187 : f32 to vector<1x32xf32>
    %300 = arith.mulf %299, %296 : vector<1x32xf32>
    %301 = arith.select %298, %296, %300 : vector<1x32xi1>, vector<1x32xf32>
    %c10 = arith.constant 10 : index
    %c0_188 = arith.constant 0 : index
    %c0_189 = arith.constant 0 : index
    %302 = vector.load %arg5[%c10, %c0_188, %c0_189] : memref<16x32x32xf32, #tpu.memory_space<vmem>>, vector<1x32x32xf32>
    %303 = vector.shape_cast %302 : vector<1x32x32xf32> to vector<32x32xf32>
    %cst_190 = arith.constant dense<0.000000e+00> : vector<1x32xf32>
    %304 = tpu.matmul %301, %303, %cst_190 {dimension_numbers = #tpu.dot_dimension_numbers<[1], [0], [0], [1], [0, 0, 1, 1], [], []>} : vector<1x32xf32>, vector<32x32xf32>, vector<1x32xf32> -> vector<1x32xf32>
    %c10_191 = arith.constant 10 : index
    %c0_192 = arith.constant 0 : index
    %c0_193 = arith.constant 0 : index
    %305 = vector.load %arg6[%c10_191, %c0_192, %c0_193] : memref<16x1x32xf32, #tpu.memory_space<vmem>>, vector<1x1x32xf32>
    %306 = vector.shape_cast %305 : vector<1x1x32xf32> to vector<1x32xf32>
    %307 = arith.addf %304, %306 : vector<1x32xf32>
    %cst_194 = arith.constant 0.000000e+00 : f32
    %308 = vector.broadcast %cst_194 : f32 to vector<1x32xf32>
    %309 = arith.cmpf ogt, %307, %308 : vector<1x32xf32>
    %cst_195 = arith.constant 1.000000e-01 : f32
    %310 = vector.broadcast %cst_195 : f32 to vector<1x32xf32>
    %311 = arith.mulf %310, %307 : vector<1x32xf32>
    %312 = arith.select %309, %307, %311 : vector<1x32xi1>, vector<1x32xf32>
    %c11 = arith.constant 11 : index
    %c0_196 = arith.constant 0 : index
    %c0_197 = arith.constant 0 : index
    %313 = vector.load %arg5[%c11, %c0_196, %c0_197] : memref<16x32x32xf32, #tpu.memory_space<vmem>>, vector<1x32x32xf32>
    %314 = vector.shape_cast %313 : vector<1x32x32xf32> to vector<32x32xf32>
    %cst_198 = arith.constant dense<0.000000e+00> : vector<1x32xf32>
    %315 = tpu.matmul %312, %314, %cst_198 {dimension_numbers = #tpu.dot_dimension_numbers<[1], [0], [0], [1], [0, 0, 1, 1], [], []>} : vector<1x32xf32>, vector<32x32xf32>, vector<1x32xf32> -> vector<1x32xf32>
    %c11_199 = arith.constant 11 : index
    %c0_200 = arith.constant 0 : index
    %c0_201 = arith.constant 0 : index
    %316 = vector.load %arg6[%c11_199, %c0_200, %c0_201] : memref<16x1x32xf32, #tpu.memory_space<vmem>>, vector<1x1x32xf32>
    %317 = vector.shape_cast %316 : vector<1x1x32xf32> to vector<1x32xf32>
    %318 = arith.addf %315, %317 : vector<1x32xf32>
    %cst_202 = arith.constant 0.000000e+00 : f32
    %319 = vector.broadcast %cst_202 : f32 to vector<1x32xf32>
    %320 = arith.cmpf ogt, %318, %319 : vector<1x32xf32>
    %cst_203 = arith.constant 1.000000e-01 : f32
    %321 = vector.broadcast %cst_203 : f32 to vector<1x32xf32>
    %322 = arith.mulf %321, %318 : vector<1x32xf32>
    %323 = arith.select %320, %318, %322 : vector<1x32xi1>, vector<1x32xf32>
    %c2_204 = arith.constant 2 : index
    %c0_205 = arith.constant 0 : index
    %c0_206 = arith.constant 0 : index
    %324 = vector.load %arg7[%c2_204, %c0_205, %c0_206] : memref<4x32x98xf32, #tpu.memory_space<vmem>>, vector<1x32x97xf32>
    %325 = vector.shape_cast %324 : vector<1x32x97xf32> to vector<32x97xf32>
    %cst_207 = arith.constant dense<0.000000e+00> : vector<1x97xf32>
    %326 = tpu.matmul %323, %325, %cst_207 {dimension_numbers = #tpu.dot_dimension_numbers<[1], [0], [0], [1], [0, 0, 1, 1], [], []>} : vector<1x32xf32>, vector<32x97xf32>, vector<1x97xf32> -> vector<1x97xf32>
    %c2_208 = arith.constant 2 : index
    %c0_209 = arith.constant 0 : index
    %c0_210 = arith.constant 0 : index
    %327 = vector.load %arg8[%c2_208, %c0_209, %c0_210] : memref<4x1x98xf32, #tpu.memory_space<vmem>>, vector<1x1x97xf32>
    %328 = vector.shape_cast %327 : vector<1x1x97xf32> to vector<1x97xf32>
    %329 = arith.addf %326, %328 : vector<1x97xf32>
    %c2_211 = arith.constant 2 : index
    %330 = memref.load %arg12[%c2_211] : memref<4xf32, #tpu.memory_space<smem>>
    %cst_212 = arith.constant 5.000000e-01 : f32
    %cst_213 = arith.constant 5.000000e+00 : f32
    %331 = arith.maximumf %cst_212, %330 : f32
    %332 = arith.minimumf %cst_213, %331 : f32
    %cst_214 = arith.constant -1.000000e+00 : f32
    %cst_215 = arith.constant 2.500000e+00 : f32
    %333 = vector.broadcast %cst_214 : f32 to vector<1x97xf32>
    %334 = arith.maximumf %333, %329 : vector<1x97xf32>
    %335 = vector.broadcast %cst_215 : f32 to vector<1x97xf32>
    %336 = arith.minimumf %335, %334 : vector<1x97xf32>
    %337 = vector.broadcast %332 : f32 to vector<1x97xf32>
    %338 = arith.divf %336, %337 : vector<1x97xf32>
    %339 = vector.extract_strided_slice %338 {offsets = [0, 0], sizes = [1, 32], strides = [1, 1]} : vector<1x97xf32> to vector<1x32xf32>
    %340 = arith.negf %339 : vector<1x32xf32>
    %341 = math.exp %340 : vector<1x32xf32>
    %cst_216 = arith.constant 1.000000e+00 : f32
    %342 = vector.broadcast %cst_216 : f32 to vector<1x32xf32>
    %343 = arith.addf %342, %341 : vector<1x32xf32>
    %344 = arith.divf %342, %343 : vector<1x32xf32>
    %345 = vector.extract_strided_slice %338 {offsets = [0, 32], sizes = [1, 32], strides = [1, 1]} : vector<1x97xf32> to vector<1x32xf32>
    %346 = arith.negf %345 : vector<1x32xf32>
    %347 = math.exp %346 : vector<1x32xf32>
    %cst_217 = arith.constant 1.000000e+00 : f32
    %348 = vector.broadcast %cst_217 : f32 to vector<1x32xf32>
    %349 = arith.addf %348, %347 : vector<1x32xf32>
    %350 = arith.divf %348, %349 : vector<1x32xf32>
    %351 = vector.extract_strided_slice %338 {offsets = [0, 64], sizes = [1, 1], strides = [1, 1]} : vector<1x97xf32> to vector<1x1xf32>
    %352 = arith.negf %351 : vector<1x1xf32>
    %353 = math.exp %352 : vector<1x1xf32>
    %cst_218 = arith.constant 1.000000e+00 : f32
    %354 = vector.broadcast %cst_218 : f32 to vector<1x1xf32>
    %355 = arith.addf %354, %353 : vector<1x1xf32>
    %356 = arith.divf %354, %355 : vector<1x1xf32>
    %357 = vector.extract_strided_slice %338 {offsets = [0, 65], sizes = [1, 32], strides = [1, 1]} : vector<1x97xf32> to vector<1x32xf32>
    %358 = arith.negf %357 : vector<1x32xf32>
    %359 = math.exp %358 : vector<1x32xf32>
    %cst_219 = arith.constant 1.000000e+00 : f32
    %360 = vector.broadcast %cst_219 : f32 to vector<1x32xf32>
    %361 = arith.addf %360, %359 : vector<1x32xf32>
    %362 = arith.divf %360, %361 : vector<1x32xf32>
    %c2_220 = arith.constant 2 : index
    %c0_221 = arith.constant 0 : index
    %c0_222 = arith.constant 0 : index
    %363 = vector.load %arg11[%c2_220, %c0_221, %c0_222] : memref<4x1x32xf32, #tpu.memory_space<vmem>>, vector<1x1x32xf32>
    %364 = vector.shape_cast %363 : vector<1x1x32xf32> to vector<1x32xf32>
    %365 = vector.broadcast %356 : vector<1x1xf32> to vector<1x32xf32>
    %366 = arith.mulf %365, %350 : vector<1x32xf32>
    %c2_223 = arith.constant 2 : index
    %c0_224 = arith.constant 0 : index
    %c0_225 = arith.constant 0 : index
    %367 = vector.load %arg10[%c2_223, %c0_224, %c0_225] : memref<4x32x32xf32, #tpu.memory_space<vmem>>, vector<1x32x32xf32>
    %368 = vector.shape_cast %367 : vector<1x32x32xf32> to vector<32x32xf32>
    %369 = vector.broadcast %344 : vector<1x32xf32> to vector<8x32xf32>
    %370 = arith.mulf %279, %369 : vector<8x32xf32>
    %371 = tpu.concatenate %279, %370 in 0 : vector<8x32xf32>, vector<8x32xf32> -> vector<16x32xf32>
    %cst_226 = arith.constant dense<0.000000e+00> : vector<16x32xf32>
    %372 = tpu.matmul %371, %368, %cst_226 {dimension_numbers = #tpu.dot_dimension_numbers<[1], [0], [0], [1], [0, 0, 1, 1], [], []>} : vector<16x32xf32>, vector<32x32xf32>, vector<16x32xf32> -> vector<16x32xf32>
    %373 = vector.extract_strided_slice %372 {offsets = [0, 0], sizes = [8, 32], strides = [1, 1]} : vector<16x32xf32> to vector<8x32xf32>
    %374 = vector.extract_strided_slice %372 {offsets = [8, 0], sizes = [8, 32], strides = [1, 1]} : vector<16x32xf32> to vector<8x32xf32>
    %375 = vector.broadcast %366 : vector<1x32xf32> to vector<8x32xf32>
    %376 = arith.mulf %375, %374 : vector<8x32xf32>
    %377 = arith.subf %373, %376 : vector<8x32xf32>
    %cst_227 = arith.constant 1.000000e+00 : f32
    %378 = vector.broadcast %cst_227 : f32 to vector<1x32xf32>
    %379 = arith.subf %378, %362 : vector<1x32xf32>
    %380 = arith.mulf %379, %364 : vector<1x32xf32>
    %381 = vector.broadcast %380 : vector<1x32xf32> to vector<8x32xf32>
    %382 = arith.addf %377, %381 : vector<8x32xf32>
    %cst_228 = arith.constant 0.000000e+00 : f32
    %383 = vector.broadcast %cst_228 : f32 to vector<8x32xf32>
    %384 = arith.maximumf %382, %383 : vector<8x32xf32>
    %c12 = arith.constant 12 : index
    %c0_229 = arith.constant 0 : index
    %c0_230 = arith.constant 0 : index
    %385 = vector.load %arg5[%c12, %c0_229, %c0_230] : memref<16x32x32xf32, #tpu.memory_space<vmem>>, vector<1x32x32xf32>
    %386 = vector.shape_cast %385 : vector<1x32x32xf32> to vector<32x32xf32>
    %cst_231 = arith.constant dense<0.000000e+00> : vector<1x32xf32>
    %387 = tpu.matmul %57, %386, %cst_231 {dimension_numbers = #tpu.dot_dimension_numbers<[1], [0], [0], [1], [0, 0, 1, 1], [], []>} : vector<1x32xf32>, vector<32x32xf32>, vector<1x32xf32> -> vector<1x32xf32>
    %c12_232 = arith.constant 12 : index
    %c0_233 = arith.constant 0 : index
    %c0_234 = arith.constant 0 : index
    %388 = vector.load %arg6[%c12_232, %c0_233, %c0_234] : memref<16x1x32xf32, #tpu.memory_space<vmem>>, vector<1x1x32xf32>
    %389 = vector.shape_cast %388 : vector<1x1x32xf32> to vector<1x32xf32>
    %390 = arith.addf %387, %389 : vector<1x32xf32>
    %cst_235 = arith.constant 0.000000e+00 : f32
    %391 = vector.broadcast %cst_235 : f32 to vector<1x32xf32>
    %392 = arith.cmpf ogt, %390, %391 : vector<1x32xf32>
    %cst_236 = arith.constant 1.000000e-01 : f32
    %393 = vector.broadcast %cst_236 : f32 to vector<1x32xf32>
    %394 = arith.mulf %393, %390 : vector<1x32xf32>
    %395 = arith.select %392, %390, %394 : vector<1x32xi1>, vector<1x32xf32>
    %c13 = arith.constant 13 : index
    %c0_237 = arith.constant 0 : index
    %c0_238 = arith.constant 0 : index
    %396 = vector.load %arg5[%c13, %c0_237, %c0_238] : memref<16x32x32xf32, #tpu.memory_space<vmem>>, vector<1x32x32xf32>
    %397 = vector.shape_cast %396 : vector<1x32x32xf32> to vector<32x32xf32>
    %cst_239 = arith.constant dense<0.000000e+00> : vector<1x32xf32>
    %398 = tpu.matmul %395, %397, %cst_239 {dimension_numbers = #tpu.dot_dimension_numbers<[1], [0], [0], [1], [0, 0, 1, 1], [], []>} : vector<1x32xf32>, vector<32x32xf32>, vector<1x32xf32> -> vector<1x32xf32>
    %c13_240 = arith.constant 13 : index
    %c0_241 = arith.constant 0 : index
    %c0_242 = arith.constant 0 : index
    %399 = vector.load %arg6[%c13_240, %c0_241, %c0_242] : memref<16x1x32xf32, #tpu.memory_space<vmem>>, vector<1x1x32xf32>
    %400 = vector.shape_cast %399 : vector<1x1x32xf32> to vector<1x32xf32>
    %401 = arith.addf %398, %400 : vector<1x32xf32>
    %cst_243 = arith.constant 0.000000e+00 : f32
    %402 = vector.broadcast %cst_243 : f32 to vector<1x32xf32>
    %403 = arith.cmpf ogt, %401, %402 : vector<1x32xf32>
    %cst_244 = arith.constant 1.000000e-01 : f32
    %404 = vector.broadcast %cst_244 : f32 to vector<1x32xf32>
    %405 = arith.mulf %404, %401 : vector<1x32xf32>
    %406 = arith.select %403, %401, %405 : vector<1x32xi1>, vector<1x32xf32>
    %c14 = arith.constant 14 : index
    %c0_245 = arith.constant 0 : index
    %c0_246 = arith.constant 0 : index
    %407 = vector.load %arg5[%c14, %c0_245, %c0_246] : memref<16x32x32xf32, #tpu.memory_space<vmem>>, vector<1x32x32xf32>
    %408 = vector.shape_cast %407 : vector<1x32x32xf32> to vector<32x32xf32>
    %cst_247 = arith.constant dense<0.000000e+00> : vector<1x32xf32>
    %409 = tpu.matmul %406, %408, %cst_247 {dimension_numbers = #tpu.dot_dimension_numbers<[1], [0], [0], [1], [0, 0, 1, 1], [], []>} : vector<1x32xf32>, vector<32x32xf32>, vector<1x32xf32> -> vector<1x32xf32>
    %c14_248 = arith.constant 14 : index
    %c0_249 = arith.constant 0 : index
    %c0_250 = arith.constant 0 : index
    %410 = vector.load %arg6[%c14_248, %c0_249, %c0_250] : memref<16x1x32xf32, #tpu.memory_space<vmem>>, vector<1x1x32xf32>
    %411 = vector.shape_cast %410 : vector<1x1x32xf32> to vector<1x32xf32>
    %412 = arith.addf %409, %411 : vector<1x32xf32>
    %cst_251 = arith.constant 0.000000e+00 : f32
    %413 = vector.broadcast %cst_251 : f32 to vector<1x32xf32>
    %414 = arith.cmpf ogt, %412, %413 : vector<1x32xf32>
    %cst_252 = arith.constant 1.000000e-01 : f32
    %415 = vector.broadcast %cst_252 : f32 to vector<1x32xf32>
    %416 = arith.mulf %415, %412 : vector<1x32xf32>
    %417 = arith.select %414, %412, %416 : vector<1x32xi1>, vector<1x32xf32>
    %c15 = arith.constant 15 : index
    %c0_253 = arith.constant 0 : index
    %c0_254 = arith.constant 0 : index
    %418 = vector.load %arg5[%c15, %c0_253, %c0_254] : memref<16x32x32xf32, #tpu.memory_space<vmem>>, vector<1x32x32xf32>
    %419 = vector.shape_cast %418 : vector<1x32x32xf32> to vector<32x32xf32>
    %cst_255 = arith.constant dense<0.000000e+00> : vector<1x32xf32>
    %420 = tpu.matmul %417, %419, %cst_255 {dimension_numbers = #tpu.dot_dimension_numbers<[1], [0], [0], [1], [0, 0, 1, 1], [], []>} : vector<1x32xf32>, vector<32x32xf32>, vector<1x32xf32> -> vector<1x32xf32>
    %c15_256 = arith.constant 15 : index
    %c0_257 = arith.constant 0 : index
    %c0_258 = arith.constant 0 : index
    %421 = vector.load %arg6[%c15_256, %c0_257, %c0_258] : memref<16x1x32xf32, #tpu.memory_space<vmem>>, vector<1x1x32xf32>
    %422 = vector.shape_cast %421 : vector<1x1x32xf32> to vector<1x32xf32>
    %423 = arith.addf %420, %422 : vector<1x32xf32>
    %cst_259 = arith.constant 0.000000e+00 : f32
    %424 = vector.broadcast %cst_259 : f32 to vector<1x32xf32>
    %425 = arith.cmpf ogt, %423, %424 : vector<1x32xf32>
    %cst_260 = arith.constant 1.000000e-01 : f32
    %426 = vector.broadcast %cst_260 : f32 to vector<1x32xf32>
    %427 = arith.mulf %426, %423 : vector<1x32xf32>
    %428 = arith.select %425, %423, %427 : vector<1x32xi1>, vector<1x32xf32>
    %c3_261 = arith.constant 3 : index
    %c0_262 = arith.constant 0 : index
    %c0_263 = arith.constant 0 : index
    %429 = vector.load %arg7[%c3_261, %c0_262, %c0_263] : memref<4x32x98xf32, #tpu.memory_space<vmem>>, vector<1x32x37xf32>
    %430 = vector.shape_cast %429 : vector<1x32x37xf32> to vector<32x37xf32>
    %cst_264 = arith.constant dense<0.000000e+00> : vector<1x37xf32>
    %431 = tpu.matmul %428, %430, %cst_264 {dimension_numbers = #tpu.dot_dimension_numbers<[1], [0], [0], [1], [0, 0, 1, 1], [], []>} : vector<1x32xf32>, vector<32x37xf32>, vector<1x37xf32> -> vector<1x37xf32>
    %c3_265 = arith.constant 3 : index
    %c0_266 = arith.constant 0 : index
    %c0_267 = arith.constant 0 : index
    %432 = vector.load %arg8[%c3_265, %c0_266, %c0_267] : memref<4x1x98xf32, #tpu.memory_space<vmem>>, vector<1x1x37xf32>
    %433 = vector.shape_cast %432 : vector<1x1x37xf32> to vector<1x37xf32>
    %434 = arith.addf %431, %433 : vector<1x37xf32>
    %c3_268 = arith.constant 3 : index
    %435 = memref.load %arg12[%c3_268] : memref<4xf32, #tpu.memory_space<smem>>
    %cst_269 = arith.constant 5.000000e-01 : f32
    %cst_270 = arith.constant 5.000000e+00 : f32
    %436 = arith.maximumf %cst_269, %435 : f32
    %437 = arith.minimumf %cst_270, %436 : f32
    %cst_271 = arith.constant -1.000000e+00 : f32
    %cst_272 = arith.constant 2.500000e+00 : f32
    %438 = vector.broadcast %cst_271 : f32 to vector<1x37xf32>
    %439 = arith.maximumf %438, %434 : vector<1x37xf32>
    %440 = vector.broadcast %cst_272 : f32 to vector<1x37xf32>
    %441 = arith.minimumf %440, %439 : vector<1x37xf32>
    %442 = vector.broadcast %437 : f32 to vector<1x37xf32>
    %443 = arith.divf %441, %442 : vector<1x37xf32>
    %444 = vector.extract_strided_slice %443 {offsets = [0, 0], sizes = [1, 32], strides = [1, 1]} : vector<1x37xf32> to vector<1x32xf32>
    %445 = arith.negf %444 : vector<1x32xf32>
    %446 = math.exp %445 : vector<1x32xf32>
    %cst_273 = arith.constant 1.000000e+00 : f32
    %447 = vector.broadcast %cst_273 : f32 to vector<1x32xf32>
    %448 = arith.addf %447, %446 : vector<1x32xf32>
    %449 = arith.divf %447, %448 : vector<1x32xf32>
    %450 = vector.extract_strided_slice %443 {offsets = [0, 32], sizes = [1, 2], strides = [1, 1]} : vector<1x37xf32> to vector<1x2xf32>
    %451 = arith.negf %450 : vector<1x2xf32>
    %452 = math.exp %451 : vector<1x2xf32>
    %cst_274 = arith.constant 1.000000e+00 : f32
    %453 = vector.broadcast %cst_274 : f32 to vector<1x2xf32>
    %454 = arith.addf %453, %452 : vector<1x2xf32>
    %455 = arith.divf %453, %454 : vector<1x2xf32>
    %456 = vector.extract_strided_slice %443 {offsets = [0, 34], sizes = [1, 1], strides = [1, 1]} : vector<1x37xf32> to vector<1x1xf32>
    %457 = arith.negf %456 : vector<1x1xf32>
    %458 = math.exp %457 : vector<1x1xf32>
    %cst_275 = arith.constant 1.000000e+00 : f32
    %459 = vector.broadcast %cst_275 : f32 to vector<1x1xf32>
    %460 = arith.addf %459, %458 : vector<1x1xf32>
    %461 = arith.divf %459, %460 : vector<1x1xf32>
    %462 = vector.extract_strided_slice %443 {offsets = [0, 35], sizes = [1, 2], strides = [1, 1]} : vector<1x37xf32> to vector<1x2xf32>
    %463 = arith.negf %462 : vector<1x2xf32>
    %464 = math.exp %463 : vector<1x2xf32>
    %cst_276 = arith.constant 1.000000e+00 : f32
    %465 = vector.broadcast %cst_276 : f32 to vector<1x2xf32>
    %466 = arith.addf %465, %464 : vector<1x2xf32>
    %467 = arith.divf %465, %466 : vector<1x2xf32>
    %c3_277 = arith.constant 3 : index
    %c0_278 = arith.constant 0 : index
    %c0_279 = arith.constant 0 : index
    %468 = vector.load %arg11[%c3_277, %c0_278, %c0_279] : memref<4x1x32xf32, #tpu.memory_space<vmem>>, vector<1x1x2xf32>
    %469 = vector.shape_cast %468 : vector<1x1x2xf32> to vector<1x2xf32>
    %470 = vector.broadcast %461 : vector<1x1xf32> to vector<1x2xf32>
    %471 = arith.mulf %470, %455 : vector<1x2xf32>
    %c3_280 = arith.constant 3 : index
    %c0_281 = arith.constant 0 : index
    %c0_282 = arith.constant 0 : index
    %472 = vector.load %arg10[%c3_280, %c0_281, %c0_282] : memref<4x32x32xf32, #tpu.memory_space<vmem>>, vector<1x32x2xf32>
    %473 = vector.shape_cast %472 : vector<1x32x2xf32> to vector<32x2xf32>
    %474 = vector.broadcast %449 : vector<1x32xf32> to vector<8x32xf32>
    %475 = arith.mulf %384, %474 : vector<8x32xf32>
    %476 = tpu.concatenate %384, %475 in 0 : vector<8x32xf32>, vector<8x32xf32> -> vector<16x32xf32>
    %cst_283 = arith.constant dense<0.000000e+00> : vector<16x2xf32>
    %477 = tpu.matmul %476, %473, %cst_283 {dimension_numbers = #tpu.dot_dimension_numbers<[1], [0], [0], [1], [0, 0, 1, 1], [], []>} : vector<16x32xf32>, vector<32x2xf32>, vector<16x2xf32> -> vector<16x2xf32>
    %478 = vector.extract_strided_slice %477 {offsets = [0, 0], sizes = [8, 2], strides = [1, 1]} : vector<16x2xf32> to vector<8x2xf32>
    %479 = vector.extract_strided_slice %477 {offsets = [8, 0], sizes = [8, 2], strides = [1, 1]} : vector<16x2xf32> to vector<8x2xf32>
    %480 = vector.broadcast %471 : vector<1x2xf32> to vector<8x2xf32>
    %481 = arith.mulf %480, %479 : vector<8x2xf32>
    %482 = arith.subf %478, %481 : vector<8x2xf32>
    %cst_284 = arith.constant 1.000000e+00 : f32
    %483 = vector.broadcast %cst_284 : f32 to vector<1x2xf32>
    %484 = arith.subf %483, %467 : vector<1x2xf32>
    %485 = arith.mulf %484, %469 : vector<1x2xf32>
    %486 = vector.broadcast %485 : vector<1x2xf32> to vector<8x2xf32>
    %487 = arith.addf %482, %486 : vector<8x2xf32>
    %488 = tpu.iota {dimensions = array<i32: 1>} : vector<8x2xi32>
    %c1_i32 = arith.constant 1 : i32
    %489 = vector.broadcast %c1_i32 : i32 to vector<8x2xi32>
    %490 = arith.cmpi slt, %488, %489 : vector<8x2xi32>
    %cst_285 = arith.constant 0.000000e+00 : f32
    %491 = vector.broadcast %cst_285 : f32 to vector<8x2xf32>
    %492 = arith.maximumf %487, %491 : vector<8x2xf32>
    %493 = vector.broadcast %cst_285 : f32 to vector<8x2xf32>
    %494 = arith.subf %487, %493 : vector<8x2xf32>
    %495 = arith.cmpf one, %494, %494 : vector<8x2xf32>
    %496 = vector.broadcast %cst_285 : f32 to vector<8x2xf32>
    %497 = arith.addf %487, %496 : vector<8x2xf32>
    %498 = math.absf %494 : vector<8x2xf32>
    %cst_286 = arith.constant 0.000000e+00 : f32
    %499 = vector.broadcast %cst_286 : f32 to vector<8x2xf32>
    %500 = arith.subf %499, %498 : vector<8x2xf32>
    %501 = math.exp %500 : vector<8x2xf32>
    %502 = math.log1p %501 : vector<8x2xf32>
    %503 = arith.addf %492, %502 : vector<8x2xf32>
    %504 = arith.select %495, %497, %503 : vector<8x2xi1>, vector<8x2xf32>
    %cst_287 = arith.constant 0.899999976 : f32
    %505 = vector.broadcast %cst_287 : f32 to vector<8x2xf32>
    %506 = arith.mulf %505, %504 : vector<8x2xf32>
    %cst_288 = arith.constant 1.000000e-01 : f32
    %507 = vector.broadcast %cst_288 : f32 to vector<8x2xf32>
    %508 = arith.addf %507, %506 : vector<8x2xf32>
    %509 = arith.select %490, %487, %508 : vector<8x2xi1>, vector<8x2xf32>
    %510 = tpu.iota {dimensions = array<i32: 0>} : vector<2x128xi32>
    %511 = tpu.iota {dimensions = array<i32: 1>} : vector<2x128xi32>
    %512 = arith.cmpi eq, %510, %511 : vector<2x128xi32>
    %513 = arith.extui %512 : vector<2x128xi1> to vector<2x128xi32>
    %514 = arith.sitofp %513 : vector<2x128xi32> to vector<2x128xf32>
    %cst_289 = arith.constant dense<0.000000e+00> : vector<8x128xf32>
    %515 = tpu.matmul %509, %514, %cst_289 {dimension_numbers = #tpu.dot_dimension_numbers<[1], [0], [0], [1], [0, 0, 1, 1], [], []>} : vector<8x2xf32>, vector<2x128xf32>, vector<8x128xf32> -> vector<8x128xf32>
    %c0_290 = arith.constant 0 : index
    %c0_291 = arith.constant 0 : index
    %c0_292 = arith.constant 0 : index
    %516 = vector.load %arg13[%c0_290, %c0_291, %c0_292] : memref<1x8x128xf32, #tpu.memory_space<vmem>>, vector<1x8x128xf32>
    %517 = vector.shape_cast %516 : vector<1x8x128xf32> to vector<8x128xf32>
    %518 = vector.shape_cast %515 : vector<8x128xf32> to vector<1x8x128xf32>
    tpu.vector_store %arg13[%c0_290, %c0_291, %c0_292], %518 {strides = array<i32>} : memref<1x8x128xf32, #tpu.memory_space<vmem>>, vector<1x8x128xf32>,
    return
  }
  func.func @transform_0(%arg0: i32) -> (i32, i32, i32) {
    %c0_i32 = arith.constant 0 : i32
    %c0_i32_0 = arith.constant 0 : i32
    %c0_i32_1 = arith.constant 0 : i32
    return %arg0, %c0_i32, %c0_i32_0 : i32, i32, i32
  }
  func.func @transform_1(%arg0: i32) -> (i32, i32, i32) {
    %c0_i32 = arith.constant 0 : i32
    %c0_i32_0 = arith.constant 0 : i32
    %c0_i32_1 = arith.constant 0 : i32
    return %arg0, %c0_i32, %c0_i32_0 : i32, i32, i32
  }
  func.func @transform_2(%arg0: i32) -> (i32, i32, i32) {
    %c0_i32 = arith.constant 0 : i32
    %c0_i32_0 = arith.constant 0 : i32
    %c0_i32_1 = arith.constant 0 : i32
    %c0_i32_2 = arith.constant 0 : i32
    return %c0_i32, %c0_i32_0, %c0_i32_1 : i32, i32, i32
  }
  func.func @transform_3(%arg0: i32) -> (i32, i32, i32) {
    %c0_i32 = arith.constant 0 : i32
    %c0_i32_0 = arith.constant 0 : i32
    %c0_i32_1 = arith.constant 0 : i32
    %c0_i32_2 = arith.constant 0 : i32
    return %c0_i32, %c0_i32_0, %c0_i32_1 : i32, i32, i32
  }
  func.func @transform_4(%arg0: i32) -> (i32, i32, i32) {
    %c0_i32 = arith.constant 0 : i32
    %c0_i32_0 = arith.constant 0 : i32
    %c0_i32_1 = arith.constant 0 : i32
    %c0_i32_2 = arith.constant 0 : i32
    return %c0_i32, %c0_i32_0, %c0_i32_1 : i32, i32, i32
  }
  func.func @transform_5(%arg0: i32) -> (i32, i32, i32) {
    %c0_i32 = arith.constant 0 : i32
    %c0_i32_0 = arith.constant 0 : i32
    %c0_i32_1 = arith.constant 0 : i32
    %c0_i32_2 = arith.constant 0 : i32
    return %c0_i32, %c0_i32_0, %c0_i32_1 : i32, i32, i32
  }
  func.func @transform_6(%arg0: i32) -> (i32, i32, i32) {
    %c0_i32 = arith.constant 0 : i32
    %c0_i32_0 = arith.constant 0 : i32
    %c0_i32_1 = arith.constant 0 : i32
    %c0_i32_2 = arith.constant 0 : i32
    return %c0_i32, %c0_i32_0, %c0_i32_1 : i32, i32, i32
  }
  func.func @transform_7(%arg0: i32) -> (i32, i32, i32) {
    %c0_i32 = arith.constant 0 : i32
    %c0_i32_0 = arith.constant 0 : i32
    %c0_i32_1 = arith.constant 0 : i32
    %c0_i32_2 = arith.constant 0 : i32
    return %c0_i32, %c0_i32_0, %c0_i32_1 : i32, i32, i32
  }
  func.func @transform_8(%arg0: i32) -> (i32, i32) {
    %c0_i32 = arith.constant 0 : i32
    %c0_i32_0 = arith.constant 0 : i32
    %c0_i32_1 = arith.constant 0 : i32
    return %c0_i32, %c0_i32_0 : i32, i32
  }
  func.func @transform_9(%arg0: i32) -> (i32, i32, i32) {
    %c0_i32 = arith.constant 0 : i32
    %c0_i32_0 = arith.constant 0 : i32
    %c0_i32_1 = arith.constant 0 : i32
    %c0_i32_2 = arith.constant 0 : i32
    return %c0_i32, %c0_i32_0, %c0_i32_1 : i32, i32, i32
  }
  func.func @transform_10(%arg0: i32) -> (i32, i32, i32) {
    %c0_i32 = arith.constant 0 : i32
    %c0_i32_0 = arith.constant 0 : i32
    %c0_i32_1 = arith.constant 0 : i32
    %c0_i32_2 = arith.constant 0 : i32
    return %c0_i32, %c0_i32_0, %c0_i32_1 : i32, i32, i32
  }
  func.func @transform_11(%arg0: i32) -> i32 {
    %c0_i32 = arith.constant 0 : i32
    %c0_i32_0 = arith.constant 0 : i32
    return %c0_i32 : i32
  }
  func.func @transform_12(%arg0: i32) -> (i32, i32, i32) {
    %c0_i32 = arith.constant 0 : i32
    %c0_i32_0 = arith.constant 0 : i32
    %c0_i32_1 = arith.constant 0 : i32
    return %arg0, %c0_i32, %c0_i32_0 : i32, i32, i32
  }
}

</mosaic_0001>

<bundles_post_ra>
// kernel: tpu_custom_call.1
= control target key start
LH: loop header
LB: loop body
LE: loop exit
PB: predicated region body
PF: predicated region fallthrough
CT: control target
= control target key end

     0   :  { %s2943_s0 = inlined_call_operand.vmem [shape: f32[2,8,2], index: 0, kind: input, shape index: {}]   ;;  %s2944_s1 = inlined_call_operand.vmem [shape: f32[2,8,1], index: 1, kind: input, shape index: {}]   ;;  %s2945_s2 = inlined_call_operand.hbm [shape: f32[6,32,32], index: 2, kind: input, shape index: {}]   ;;  %s2946_s3 = inlined_call_operand.vmem [shape: f32[6,1,32], index: 3, kind: input, shape index: {}]   ;;  %s2947_s4 = inlined_call_operand.hbm [shape: f32[16,32,32], index: 4, kind: input, shape index: {}]   ;;  %s2948_s5 = inlined_call_operand.vmem [shape: f32[16,1,32], index: 5, kind: input, shape index: {}]   ;;  %s2949_s6 = inlined_call_operand.hbm [shape: f32[4,32,98], index: 6, kind: input, shape index: {}]   ;;  %s2950_s7 = inlined_call_operand.vmem [shape: f32[4,1,98], index: 7, kind: input, shape index: {}]   ;;  %s2951_s8 = inlined_call_operand.vmem [shape: f32[1,32], index: 8, kind: input, shape index: {}]   ;;  %s2952_s9 = inlined_call_operand.hbm [shape: f32[4,32,32], index: 9, kind: input, shape index: {}]   ;;  %s2953_s10 = inlined_call_operand.vmem [shape: f32[4,1,32], index: 10, kind: input, shape index: {}]   ;;  %s2954_s11 = inlined_call_operand.vmem [shape: f32[4], index: 11, kind: input, shape index: {}]   ;;  %s2955_s12 = inlined_call_operand.hbm [shape: f32[2,8,128], index: 12, kind: output, shape index: {}]  }
   0x1   :  { %2962 = sst [smem:[#allocation24_spill]] %s2945_s2 }
   0x2   :  { %2963 = sst [smem:[#allocation25_spill]] %s2947_s4 }
   0x3   :  { %17 = vsyncpa [#allocation3], 0 }
   0x4   :  { %18 = vsyncpa [#allocation7], 0 }
   0x5   :  { %19 = vsyncpa [#allocation10], 0 }
   0x6   :  { %20 = vsyncpa [#allocation5], 0 }
   0x7   :  { %21 = vsyncpa [#allocation4], 0 }
   0x8   :  { %23 = vsyncpa [#allocation4 + $0x1], 0  ;;  %s2603_s21 = smov 0   ;;  %s2605_s22 = smov 0  }
   0x9   :  { %s2607_s23 = smov 0   ;;  %s2609_s24 = smov 0  }
   0xa LB: > { %2964 = sst [smem:[#allocation18_spill]] %s2499_s21  ;;  %s2624_s25 = sadd.s32 4294967295, %s2511_s24   ;;  %s2511_s24 = sphi %s2609_s24, %s2979_s24   ;;  %s2507_s23 = sphi %s2607_s23, %s2981_s23   ;;  %s2503_s22 = sphi %s2605_s22, %s2983_s22   ;;  %s2499_s21 = sphi %s2603_s21, %s2982_s21  }
   0xb   : > { %2965 = sst [smem:[#allocation19_spill]] %s2507_s23  ;;  %s2049_s26 = sadd.s32 4294967294, %s2511_s24  }
   0xc   : > { %2966 = sst [smem:[#allocation20_spill]] %s2511_s24  ;;  %s2628_s27 = sadd.s32 1, %s2511_s24  }
   0xd   : > { %2967 = sst [smem:[#allocation21_spill]] %s2628_s27  ;;  %s298_s28 = sadd.s32 1, %s2507_s23 }
   0xe   : > { %s295_s29 = ssub.s32 %s2511_s24, %s2628_s27  ;;  %p308_p0 = scmp.ne.s32.totalorder %s2507_s23, %s2503_s22 }
   0xf   : > { %p296_p1 = scmp.eq.s32.totalorder %s295_s29, 0  ;;  %p309_p2 = scmp.eq.s32.totalorder %s2624_s25, 1 }
  0x10   : > { %p314_p3 = scmp.ne.s32.totalorder %s2503_s22, %s2499_s21  ;;  %p315_p4 = scmp.eq.s32.totalorder %s2049_s26, 1 }
  0x11   : > { %s2639_s30 = scalar_select %p296_p1, %s2507_s23, %s298_s28  }
  0x12   : > { %p2641_p5 = por %p309_p2, %p308_p0  ;;  %p2645_p6 = por %p315_p4, %p314_p3 }
  0x13   : > { %2968 = sst [smem:[#allocation22_spill]] %s2639_s30  ;;  %p2050_p7 = scmp.ge.s32.totalorder %s2511_s24, 1 }
  0x14   : > { %s2970_s14 = scalar_select %p2645_p6, 1, 0 }
  0x15   : > { %p322_p8 = scmp.lt.s32.totalorder %s2511_s24, 3  ;;  %p2186_p9 = scmp.eq.s32.totalorder %s2624_s25, 0 }
  0x16   : > { %2971 = sst [smem:[#allocation23_spill]] %s2970_s14  ;;  %s2513_s29 = smov [#allocation6]  }
  0x17   : > { %p2652_p10 = pnand %p2050_p7, %p322_p8  ;;  %s2973_s4 = sld [smem:[#allocation25_spill]] }
  0x18   : > { %s2974_s2 = sld [smem:[#allocation24_spill]]  ;;  %s352_s30 = sshll.u32 %s2513_s29, 4  ;;  %s353_s30 = int_to_ptr.vmem [resolvable:$true] %s352_s30 }
  0x19   : > { %p2166_p11 = pneg %p2652_p10  ;;  %s2514_s16 = smov 128  }
  0x1a   : > { %s2515_s17 = smov 8   ;;  %s387_s14 = sshll.u32 %s2952_s9, 4  ;;  %s388_s14 = int_to_ptr.hbm [resolvable:$true] %s387_s14 }
  0x1b   : > { %p2666_p12 = pnand %p2186_p9, %p2166_p11  ;;  %s2517_s21 = smov [#allocation8]  }
  0x1c   : > { %s369_s24 = sshll.u32 %s2517_s21, 4  ;;  %s405_s20 = sshll.u32 %s2954_s11, 4  ;;  %s370_s24 = int_to_ptr.vmem [resolvable:$true] %s369_s24  ;;  %s406_s20 = int_to_ptr.vmem [resolvable:$true] %s405_s20 }
  0x1d   : > { %s350_s18 = sshll.u32 %s2973_s4, 4  ;;  %s2516_s4 = smov [#allocation2]   ;;  %s351_s18 = int_to_ptr.hbm [resolvable:$true] %s350_s18 }
  0x1e   : > { %s333_s26 = sshll.u32 %s2974_s2, 4  ;;  %s335_s23 = sshll.u32 %s2516_s4, 4  ;;  %s334_s26 = int_to_ptr.hbm [resolvable:$true] %s333_s26  ;;  %s336_s23 = int_to_ptr.vmem [resolvable:$true] %s335_s23 }
  0x1f   : > { %2172 = dma.hbm_to_vmem [thread:$0]  (!%p2666_p12), %s351_s18, 8192, %s353_s30, [#allocation7], %s2514_s16, %s2514_s16, %s2515_s17  }
  0x20   : > { %s367_s2 = sshll.u32 %s2949_s6, 4  ;;  %s2518_s4 = smov [#allocation9]   ;;  %s368_s2 = int_to_ptr.hbm [resolvable:$true] %s367_s2 }
  0x21   : > { %2169 = dma.hbm_to_vmem [thread:$0]  (!%p2666_p12), %s334_s26, 3072, %s336_s23, [#allocation3], %s2514_s16, %s2514_s16, %s2515_s17  }
  0x22   : > { %2175 = dma.hbm_to_vmem [thread:$0]  (!%p2666_p12), %s368_s2, 2048, %s370_s24, [#allocation7], %s2514_s16, %s2514_s16, %s2515_s17  }
  0x23   : > { %s389_s30 = sshll.u32 %s2518_s4, 4  ;;  %s2519_s23 = smov [#allocation11]   ;;  %s390_s30 = int_to_ptr.vmem [resolvable:$true] %s389_s30 }
  0x24   : > { %2178 = dma.hbm_to_vmem [thread:$0]  (!%p2666_p12), %s388_s14, 2048, %s390_s30, [#allocation10], %s2514_s16, %s2514_s16, %s2515_s17  }
  0x25   : > { %2181 = dma.vmem_to_smem (!%p2666_p12), %s406_s20, 16, %s2519_s23, [#allocation5]  }
  0x26   : > { %432 = sbr.rel (%p2652_p10) target bundleno = 3389 (0xd3d), region = 68 }
  0x2b   : > { %2478 = dma.done.wait (%p2186_p9), [#allocation3], 3072  }
  0x2c   : > { %2480 = vsyncadd (%p2186_p9), [#allocation3], 4294964224 }
  0x2d   : > { %2482 = dma.done.wait (%p2186_p9), [#allocation7], 10240  }
  0x2e   : > { %2484 = vsyncadd (%p2186_p9), [#allocation7], 4294957056 }
  0x2f   : > { %2486 = dma.done.wait (%p2186_p9), [#allocation10], 2048  }
  0x30   : > { %2488 = vsyncadd (%p2186_p9), [#allocation10], 4294965248 }
  0x31   : > { %2490 = dma.done.wait (%p2186_p9), [#allocation5], 16  }
  0x32   : > { %2492 = vsyncadd (%p2186_p9), [#allocation5], 4294967280 }
  0x33   : > { %459 = sfence }
  0x34   : > { %v508_v0 = vld [vmem:[#allocation2] sm:$0x3]  ;;  %vm517_vm0 = vcmask 1041408   ;;  %p499_p13 = scmp.lt.s32.totalorder %s2624_s25, 1  ;;  %v546_v1 = vld [vmem:[#allocation2 + $0x38] sm:$0xff]  ;;  %vm513_vm1 = vcmask 15360  }
  0x35   : > { %2066 = vmatpush.msk.msra.mxu0 %vm517_vm0, %v508_v0  ;;  %568 = vmatpush.msra.mxu1 %v546_v1  ;;  %v545_v3 = vld [vmem:[#allocation2 + $0x30] sm:$0xff]  ;;  %v544_v4 = vld [vmem:[#allocation2 + $0x28] sm:$0xff]  ;;  %v543_v5 = vld [vmem:[#allocation2 + $0x20] sm:$0xff]  ;;  %vm552_vm2 = vcmask 261120   ;;  %v2520_v47 = vmov 8.0   ;;  %vm947_vm5 = vcmask 1040384  }
  0x36   : > { %s2710_s2 = scalar_select %p499_p13, %s2624_s25, 1  ;;  %v581_v6 = vld [vmem:[#allocation2 + $0x58] sm:$0xff]  ;;  %v580_v7 = vld [vmem:[#allocation2 + $0x50] sm:$0xff]  ;;  %v2258_v8 = vld [vmem:[%s2946_s3] ss:$0 sm:$0xff]  ;;  %2268 = vrcp.f32 %v2520_v47  ;;  %vm940_vm6 = vcmask 7168  }
  0x37   : > { %569 = vmatpush.msra.mxu1 %v545_v3  ;;  %602 = vmatpush.msrb.mxu0 %v581_v6  ;;  %v579_v12 = vld [vmem:[#allocation2 + $0x48] sm:$0xff]  ;;  %v578_v13 = vld [vmem:[#allocation2 + $0x40] sm:$0xff]  ;;  %v615_v14 = vld [vmem:[#allocation2 + $0x78] sm:$0xff]  ;;  %s886_s18 = sld [smem:[#allocation11]]  ;;  %s2521_s19 = smov 0.5  }
  0x38   : > { %s2064_s21 = sshll.u32 %s2710_s2, 3  ;;  %636 = vmatpush.msra.mxu3 %v615_v14  ;;  %v2259_v15 = vld [vmem:[%s2946_s3 + $0x1] ss:$0 sm:$0xff]  ;;  %v614_v19 = vld [vmem:[#allocation2 + $0x70] sm:$0xff]  ;;  %v613_v20 = vld [vmem:[#allocation2 + $0x68] sm:$0xff]  ;;  %s2522_s23 = smov 5.0  }
  0x39   : > { %s502_s14 = scalar_lea.vmem %s2943_s0, %s2064_s21  ;;  %570 = vmatpush.msra.mxu1 %v544_v4  ;;  %603 = vmatpush.msrb.mxu0 %v580_v7  ;;  %v612_v21 = vld [vmem:[#allocation2 + $0x60] sm:$0xff]  ;;  %v649_v22 = vld [vmem:[#allocation2 + $0x98] sm:$0xff]  ;;  %v648_v23 = vld [vmem:[#allocation2 + $0x90] sm:$0xff]  ;;  %s506_s26 = scalar_lea.vmem %s2944_s1, %s2064_s21 }
  0x3a   : > { %v507_v2 = vld [vmem:[%s502_s14] sm:$0xff]  ;;  %637 = vmatpush.msra.mxu3 %v614_v19  ;;  %v647_v28 = vld [vmem:[#allocation2 + $0x88] sm:$0xff]  ;;  %v683_v30 = vld [vmem:[#allocation2 + $0xb8] sm:$0xff]  ;;  %s2524_s28 = smov 127   ;;  %s2525_s21 = smov 33  }
  0x3b   : > { %2067 = vmatmul.msk.f32.vlgmr.msra.gmra.mxu0 %vm513_vm1, %v507_v2  ;;  %571 = vmatpush.msra.mxu1 %v543_v5  ;;  %v2260_v24 = vld [vmem:[%s2946_s3 + $0x2] ss:$0 sm:$0xff]  ;;  %v682_v31 = vld [vmem:[#allocation2 + $0xb0] sm:$0xff]  ;;  %v2261_v32 = vld [vmem:[%s2946_s3 + $0x3] ss:$0 sm:$0xff]  ;;  %s2527_s27 = smov 95  }
  0x3c   : > { %604 = vmatpush.msrb.mxu0 %v579_v12  ;;  %638 = vmatpush.msra.mxu3 %v613_v20  ;;  %v646_v29 = vld [vmem:[#allocation2 + $0x80] sm:$0xff]  ;;  %v681_v36 = vld [vmem:[#allocation2 + $0xa8] sm:$0xff]  ;;  %v731_v42 = vld [vmem:[#allocation6 + $0x18] sm:$0xff]  ;;  %v2269_v48 = vpop.eup %2268  ;;  %s2102_s29 = sld [smem:[#allocation11 + $0x1]] }
  0x3d   : > { %704 = vmatpush.msrb.mxu1 %v683_v30  ;;  %v680_v37 = vld [vmem:[#allocation2 + $0xa0] sm:$0xff]  ;;  %748 = vmatpush.msra.mxu2 %v731_v42  ;;  %v730_v43 = vld [vmem:[#allocation6 + $0x10] sm:$0xff]  ;;  %v729_v44 = vld [vmem:[#allocation6 + $0x8] sm:$0xff]  ;;  %v720_v50 = vmul.f32 8.0, %v2269_v48  ;;  %vm724_vm3 = vweird.f32 %v2269_v48  ;;  %s887_s20 = smax.f32 %s2521_s19, %s886_s18  ;;  %s2526_s18 = smov 66  }
  0x3e   : > { %605 = vmatpush.msrb.mxu0 %v578_v13  ;;  %639 = vmatpush.msra.mxu3 %v612_v21  ;;  %v2262_v38 = vld [vmem:[%s2946_s3 + $0x4] ss:$0 sm:$0xff]  ;;  %v763_v46 = vld [vmem:[#allocation6 + $0x38] sm:$0xff]  ;;  %v2263_v49 = vld [vmem:[%s2946_s3 + $0x5] ss:$0 sm:$0xff]  ;;  %s888_s24 = smin.f32 %s2522_s23, %s887_s20  ;;  %s2533_s20 = smov 96  }
  0x3f   : > { %705 = vmatpush.msrb.mxu1 %v682_v31  ;;  %749 = vmatpush.msra.mxu2 %v730_v43  ;;  %v728_v45 = vld [vmem:[#allocation6] sm:$0xff]  ;;  %v721_v53 = vsub.f32 1.0, %v720_v50  ;;  %v762_v1 = vld [vmem:[#allocation6 + $0x30] sm:$0xff]  ;;  %v761_v2 = vld [vmem:[#allocation6 + $0x28] sm:$0xff] }
  0x40   : > { %670 = vmatpush.msra.mxu0 %v649_v22  ;;  %781 = vmatpush.msrb.mxu3 %v763_v46  ;;  %v760_v3 = vld [vmem:[#allocation6 + $0x20] sm:$0xff]  ;;  %v796_v4 = vld [vmem:[#allocation6 + $0x58] sm:$0xff]  ;;  %v891_v46 = vstv %s888_s24 }
  0x41   : > { %706 = vmatpush.msrb.mxu1 %v681_v36  ;;  %750 = vmatpush.msra.mxu2 %v729_v44  ;;  %v722_v56 = vmul.f32 %v2269_v48, %v721_v53  ;;  %v732_v5 = vld [vmem:[%s2948_s5] sm:$0x1]  ;;  %v937_v14 = vld [vmem:[#allocation9 + $0x18] sm:$0xff]  ;;  %v2079_v20 = vld [vmem:[%s2948_s5 + $0x1] sm:$0x1]  ;;  %2270 = vrcp.f32 %v891_v46  ;;  %vm897_vm10 = vweird.f32 %v891_v46 }
  0x42   : > { %671 = vmatpush.msra.mxu0 %v648_v23  ;;  %782 = vmatpush.msrb.mxu3 %v762_v1  ;;  %v793_v12 = vld [vmem:[#allocation6 + $0x40] sm:$0xff]  ;;  %v829_v19 = vld [vmem:[#allocation6 + $0x78] sm:$0xff]  ;;  %s1210_s4 = smax.f32 %s2521_s19, %s2102_s29 }
  0x43   : > { %707 = vmatpush.msrb.mxu1 %v680_v37  ;;  %751 = vmatpush.msra.mxu2 %v728_v45  ;;  %v723_v59 = vadd.f32 %v2269_v48, %v722_v56  ;;  %v2756_v13 = vld [vmem:[%s506_s26] sm:$0xff]  ;;  %v1054_v37 = vld [vmem:[#allocation6 + $0x98] sm:$0xff]  ;;  %s2528_s26 = smov 65   ;;  %s1211_s30 = smin.f32 %s2522_s23, %s1210_s4 }
  0x44   : > { %672 = vmatpush.msra.mxu0 %v647_v28  ;;  %783 = vmatpush.msrb.mxu3 %v761_v2  ;;  %v861_v28 = vld [vmem:[#allocation8 + $0x18] sm:$0xff]  ;;  %v858_v36 = vld [vmem:[#allocation8] sm:$0xff]  ;;  %s2117_s4 = sld [smem:[#allocation11 + $0x2]] }
  0x45   : > { %v725_v62 = vsel %vm724_vm3, %v2269_v48, %v723_v59  ;;  %878 = vmatpush.msrb.mxu2 %v861_v28  ;;  %v1084_v47 = vld [vmem:[#allocation6 + $0xb8] sm:$0xff]  ;;  %v1083_v48 = vld [vmem:[#allocation6 + $0xb0] sm:$0xff]  ;;  %v1081_v50 = vld [vmem:[#allocation6 + $0xa0] sm:$0xff] }
  0x46   : > { %673 = vmatpush.msra.mxu0 %v646_v29  ;;  %784 = vmatpush.msrb.mxu3 %v760_v3  ;;  %v2081_v29 = vld [vmem:[%s2948_s5 + $0x2] sm:$0x1]  ;;  %v2092_v3 = vld [vmem:[%s2948_s5 + $0x4] sm:$0x1]  ;;  %v1115_v28 = vld [vmem:[#allocation6 + $0xc8] sm:$0xff] }
  0xb8   : > { %v538_v9 = vpop.f32.mrf.mxu0 }
  0xb9   : > { %v539_v10 = vadd.f32 %v2258_v8, %v538_v9 }
  0xbb   : > { %v541_v11 = vmax.f32 %v539_v10, 0.0  ;;  %v795_v10 = vld [vmem:[#allocation6 + $0x50] sm:$0xff] }
  0xbd   : > { %2069 = vmatmul.msk.f32.vlgmr.msra.gmra.mxu1 %vm552_vm2, %v541_v11  ;;  %v794_v11 = vld [vmem:[#allocation6 + $0x48] sm:$0xff] }
  0xbe   : > { %847 = vmatpush.msra.mxu1 %v829_v19 }
 0x13a   : > { %v573_v16 = vpop.f32.mrf.mxu1 }
 0x13b   : > { %v574_v17 = vadd.f32 %v2259_v15, %v573_v16  ;;  %v933_v15 = vld [vmem:[%s2951_s8] sm:$0x1]  ;;  %v936_v16 = vld [vmem:[#allocation9 + $0x10] sm:$0xff] }
 0x13d   : > { %v576_v18 = vmax.f32 %v574_v17, 0.0  ;;  %v935_v17 = vld [vmem:[#allocation9 + $0x8] sm:$0xff] }
 0x13f   : > { %2071 = vmatmul.msk.f32.vlgmr.msrb.gmra.mxu0 %vm552_vm2, %v576_v18  ;;  %v934_v18 = vld [vmem:[#allocation9] sm:$0xff] }
 0x140   : > { %814 = vmatpush.msrb.mxu0 %v796_v4 }
 0x142   : > { %815 = vmatpush.msrb.mxu0 %v795_v10 }
 0x144   : > { %816 = vmatpush.msrb.mxu0 %v794_v11 }
 0x146   : > { %817 = vmatpush.msrb.mxu0 %v793_v12 }
 0x1bc   : > { %v607_v25 = vpop.f32.mrf.mxu0 }
 0x1bd   : > { %v608_v26 = vadd.f32 %v2260_v24, %v607_v25  ;;  %v828_v25 = vld [vmem:[#allocation6 + $0x70] sm:$0xff] }
 0x1be   : > { %848 = vmatpush.msra.mxu1 %v828_v25 }
 0x1bf   : > { %v610_v27 = vmax.f32 %v608_v26, 0.0  ;;  %v827_v26 = vld [vmem:[#allocation6 + $0x68] sm:$0xff] }
 0x1c0   : > { %849 = vmatpush.msra.mxu1 %v827_v26  ;;  %v1117_v26 = vld [vmem:[#allocation6 + $0xd8] sm:$0xff] }
 0x1c1   : > { %2073 = vmatmul.msk.f32.vlgmr.msra.gmra.mxu3 %vm552_vm2, %v610_v27  ;;  %v826_v27 = vld [vmem:[#allocation6 + $0x60] sm:$0xff] }
 0x1c2   : > { %2087 = vmatpush.msk.msra.mxu3 %vm947_vm5, %v933_v15  ;;  %850 = vmatpush.msra.mxu1 %v826_v27  ;;  %v1116_v27 = vld [vmem:[#allocation6 + $0xd0] sm:$0xff] }
 0x244   : > { %v641_v33 = vpop.f32.mrf.mxu3 }
 0x245   : > { %v642_v34 = vadd.f32 %v2261_v32, %v641_v33 }
 0x247   : > { %v644_v35 = vmax.f32 %v642_v34, 0.0  ;;  %v860_v34 = vld [vmem:[#allocation8 + $0x10] sm:$0xff] }
 0x248   : > { %879 = vmatpush.msrb.mxu2 %v860_v34  ;;  %v1322_v34 = vld [vmem:[#allocation6 + $0x118] sm:$0xff] }
 0x249   : > { %2075 = vmatmul.msk.f32.vlgmr.msra.gmra.mxu0 %vm552_vm2, %v644_v35  ;;  %v859_v35 = vld [vmem:[#allocation8 + $0x8] sm:$0xff] }
 0x24a   : > { %986 = vmatpush.msra.mxu0 %v937_v14  ;;  %880 = vmatpush.msrb.mxu2 %v859_v35 }
 0x24c   : > { %987 = vmatpush.msra.mxu0 %v936_v16  ;;  %881 = vmatpush.msrb.mxu2 %v858_v36  ;;  %v1321_v36 = vld [vmem:[#allocation6 + $0x110] sm:$0xff] }
 0x24e   : > { %988 = vmatpush.msra.mxu0 %v935_v17 }
 0x250   : > { %989 = vmatpush.msra.mxu0 %v934_v18 }
 0x2c6   : > { %v675_v39 = vpop.f32.mrf.mxu0 }
 0x2c7   : > { %v676_v40 = vadd.f32 %v2262_v38, %v675_v39  ;;  %v1053_v38 = vld [vmem:[#allocation6 + $0x90] sm:$0xff]  ;;  %v1052_v39 = vld [vmem:[#allocation6 + $0x88] sm:$0xff] }
 0x2c9   : > { %v678_v41 = vmax.f32 %v676_v40, 0.0  ;;  %v1051_v40 = vld [vmem:[#allocation6 + $0x80] sm:$0xff] }
 0x2cb   : > { %2077 = vmatmul.msk.f32.vlgmr.msrb.gmra.mxu1 %vm552_vm2, %v678_v41  ;;  %v2083_v41 = vld [vmem:[%s2948_s5 + $0x3] sm:$0x1] }
 0x2cc   : > { %1013 = vmatpush.msrb.mxu1 %v937_v14 }
 0x2ce   : > { %1014 = vmatpush.msrb.mxu1 %v936_v16 }
 0x2d0   : > { %1015 = vmatpush.msrb.mxu1 %v935_v17 }
 0x2d2   : > { %1016 = vmatpush.msrb.mxu1 %v934_v18 }
 0x348   : > { %v709_v51 = vpop.f32.mrf.mxu1 }
 0x349   : > { %v710_v52 = vadd.f32 %v2263_v49, %v709_v51  ;;  %v1082_v49 = vld [vmem:[#allocation6 + $0xa8] sm:$0xff]  ;;  %v2271_v51 = vpop.eup %2270 }
 0x34a   : > { %vm898_vm11 = vweird.f32 %v2271_v51 }
 0x34b   : > { %v712_v54 = vsel %vm552_vm2, %v710_v52, 0.0  ;;  %v893_v52 = vmul.f32 %v2271_v51, %v891_v46  ;;  %vm899_vm12 = vmor %vm897_vm10, %vm898_vm11 }
 0x34c   : > { %v713_v55 = vrot.slane %v712_v54, 4 }
 0x34d   : > { %v894_v53 = vsub.f32 1.0, %v893_v52 }
 0x34e   : > { %v714_v57 = vadd.f32 %v713_v55, %v712_v54  ;;  %v903_v55 = vand.u32 2147483648, %v891_v46 }
 0x34f   : > { %v895_v54 = vmul.f32 %v2271_v51, %v894_v53 }
 0x350   : > { %v715_v58 = vrot.slane %v714_v57, 2 }
 0x351   : > { %v896_v56 = vadd.f32 %v2271_v51, %v895_v54  ;;  %v2096_v54 = vld [vmem:[%s2948_s5 + $0x6] sm:$0x1] }
 0x352   : > { %v716_v60 = vadd.f32 %v715_v58, %v714_v57  ;;  %v901_v57 = vand.u32 2147483647, %v891_v46  ;;  %v862_v58 = vld [vmem:[%s2950_s7] sm:$0x1]  ;;  %v1351_v46 = vld [vmem:[#allocation6 + $0x130] sm:$0xff] }
 0x354   : > { %v717_v61 = vrot.slane %v716_v60, 1  ;;  %vm902_vm13 = vcmp.eq.f32.partialorder %v901_v57, 8.507059e+37  ;;  %v2264_v57 = vld [vmem:[%s2953_s10] ss:$0 sm:$0xff] }
 0x356   : > { %v718_v63 = vadd.f32 %v717_v61, %v716_v60  ;;  %v904_v60 = vor.u32 1.1754944e-38, %v903_v55 }
 0x358   : > { %v2743_v0 = vmul.f32 %v725_v62, %v718_v63  ;;  %v900_v62 = vsel %vm899_vm12, %v2271_v51, %v896_v56 }
 0x359   : > { %v905_v1 = vsel %vm902_vm13, %v904_v60, %v900_v62  ;;  %v2107_v60 = vld [vmem:[%s2948_s5 + $0x8] sm:$0x1] }
 0x35a   : > { %2078 = vmatmul.msk.f32.vlgmr.msra.gmra.mxu2 %vm552_vm2, %v2743_v0 }
 0x35b   : > { %1069 = vmatpush.msra.mxu2 %v1054_v37  ;;  %v1320_v37 = vld [vmem:[#allocation6 + $0x108] sm:$0xff] }
 0x35d   : > { %1070 = vmatpush.msra.mxu2 %v1053_v38 }
 0x35f   : > { %1071 = vmatpush.msra.mxu2 %v1052_v39  ;;  %v1319_v39 = vld [vmem:[#allocation6 + $0x100] sm:$0xff] }
 0x361   : > { %1072 = vmatpush.msra.mxu2 %v1051_v40 }
 0x3dd   : > { %v753_v6 = vpop.f32.mrf.mxu2 }
 0x3de   : > { %v754_v7 = vadd.f32 %v753_v6, %v732_v5 }
 0x3e0   : > { %vm756_vm4 = vcmp.gt.f32.partialorder %v754_v7, 0.0  ;;  %v757_v8 = vmul.f32 0.1, %v754_v7 }
 0x3e2   : > { %v758_v9 = vsel %vm756_vm4, %v754_v7, %v757_v8  ;;  %v2523_v8 = vmov 65  }
 0x3e3   : > { %2080 = vmatmul.msk.f32.vlgmr.msrb.gmra.mxu3 %vm552_vm2, %v758_v9  ;;  %2254 = vset.pattern.permute.xlu0 %v2523_v8 }
 0x3eb   : > { %2088 = vmatmul.msk.f32.vlgmr.msra.gmra.mxu3 %vm940_vm6, %v2756_v13 }
 0x466   : > { %v786_v21 = vpop.f32.mrf.mxu3 }
 0x467   : > { %v787_v22 = vadd.f32 %v2079_v20, %v786_v21 }
 0x469   : > { %vm789_vm7 = vcmp.gt.f32.partialorder %v787_v22, 0.0  ;;  %v790_v23 = vmul.f32 0.1, %v787_v22 }
 0x46b   : > { %v791_v24 = vsel %vm789_vm7, %v787_v22, %v790_v23 }
 0x46c   : > { %2082 = vmatmul.msk.f32.vlgmr.msrb.gmra.mxu0 %vm552_vm2, %v791_v24 }
 0x46d   : > { %1102 = vmatpush.msrb.mxu0 %v1084_v47  ;;  %v1350_v47 = vld [vmem:[#allocation6 + $0x128] sm:$0xff] }
 0x46f   : > { %1103 = vmatpush.msrb.mxu0 %v1083_v48  ;;  %v1349_v48 = vld [vmem:[#allocation6 + $0x120] sm:$0xff] }
 0x471   : > { %1104 = vmatpush.msrb.mxu0 %v1082_v49  ;;  %v2805_v49 = vpop.f32.mrf.mxu3 }
 0x473   : > { %1105 = vmatpush.msrb.mxu0 %v1081_v50 }
 0x474   : > { %2090 = vmatmul.msk.f32.vlgmr.msra.gmra.mxu0 %vm552_vm2, %v2743_v0 }
 0x4e9   : > { %v819_v30 = vpop.f32.mrf.mxu0 }
 0x4ea   : > { %v820_v31 = vadd.f32 %v2081_v29, %v819_v30  ;;  %v1114_v29 = vld [vmem:[#allocation6 + $0xc0] sm:$0xff] }
 0x4ec   : > { %vm822_vm8 = vcmp.gt.f32.partialorder %v820_v31, 0.0  ;;  %v823_v32 = vmul.f32 0.1, %v820_v31 }
 0x4ee   : > { %v824_v33 = vsel %vm822_vm8, %v820_v31, %v823_v32  ;;  %v2094_v31 = vld [vmem:[%s2948_s5 + $0x5] sm:$0x1] }
 0x4ef   : > { %2084 = vmatmul.msk.f32.vlgmr.msra.gmra.mxu1 %vm552_vm2, %v824_v33 }
 0x4f0   : > { %1135 = vmatpush.msra.mxu1 %v1117_v26  ;;  %v2109_v26 = vld [vmem:[%s2948_s5 + $0x9] sm:$0x1] }
 0x4f1   : > { %v2795_v30 = vpop.f32.mrf.mxu0 }
 0x4f2   : > { %1136 = vmatpush.msra.mxu1 %v1116_v27 }
 0x4f4   : > { %1137 = vmatpush.msra.mxu1 %v1115_v28 }
 0x4f6   : > { %1138 = vmatpush.msra.mxu1 %v1114_v29 }
 0x56c   : > { %v852_v42 = vpop.f32.mrf.mxu1 }
 0x56d   : > { %v853_v43 = vadd.f32 %v2083_v41, %v852_v42  ;;  %v1150_v41 = vld [vmem:[#allocation6 + $0xf8] sm:$0xff]  ;;  %v1149_v42 = vld [vmem:[#allocation6 + $0xf0] sm:$0xff] }
 0x56f   : > { %vm855_vm9 = vcmp.gt.f32.partialorder %v853_v43, 0.0  ;;  %v856_v44 = vmul.f32 0.1, %v853_v43 }
 0x571   : > { %v857_v45 = vsel %vm855_vm9, %v853_v43, %v856_v44  ;;  %v1148_v43 = vld [vmem:[#allocation6 + $0xe8] sm:$0xff]  ;;  %v1147_v44 = vld [vmem:[#allocation6 + $0xe0] sm:$0xff] }
 0x572   : > { %2085 = vmatmul.msk.f32.vlgmr.msrb.gmra.mxu2 %vm552_vm2, %v857_v45  ;;  %v1352_v45 = vld [vmem:[#allocation6 + $0x138] sm:$0xff] }
 0x573   : > { %1168 = vmatpush.msrb.mxu2 %v1150_v41 }
 0x575   : > { %1169 = vmatpush.msrb.mxu2 %v1149_v42  ;;  %v1214_v42 = vstv %s1211_s30  ;;  %s1478_s30 = smax.f32 %s2521_s19, %s2117_s4  ;;  %s2534_s4 = smov 35  }
 0x576   : > { %vm1220_vm11 = vweird.f32 %v1214_v42 }
 0x577   : > { %1170 = vmatpush.msrb.mxu2 %v1148_v43  ;;  %v1418_v43 = vld [vmem:[#allocation6 + $0x178] sm:$0xff] }
 0x579   : > { %1171 = vmatpush.msrb.mxu2 %v1147_v44  ;;  %v1416_v44 = vld [vmem:[#allocation6 + $0x168] sm:$0xff] }
 0x57a   : > { %2093 = vmatmul.msk.f32.vlgmr.msra.gmra.mxu2 %vm552_vm2, %v2743_v0 }
 0x57b   : > { %1370 = vmatpush.msra.mxu2 %v1352_v45  ;;  %v1415_v45 = vld [vmem:[#allocation6 + $0x160] sm:$0xff] }
 0x57d   : > { %1371 = vmatpush.msra.mxu2 %v1351_v46 }
 0x57f   : > { %1372 = vmatpush.msra.mxu2 %v1350_v47 }
 0x581   : > { %1373 = vmatpush.msra.mxu2 %v1349_v48 }
 0x5f5   : > { %v883_v59 = vpop.f32.mrf.mxu2 }
 0x5f6   : > { %v884_v61 = vadd.f32 %v883_v59, %v862_v58 }
 0x5f8   : > { %v889_v63 = vmax.f32 %v884_v61, -1.0 }
 0x5fa   : > { %v890_v2 = vmin.f32 %v889_v63, 2.5 }
 0x5fc   : > { %v906_v4 = vmul.f32 %v905_v1, %v890_v2  ;;  %v1183_v2 = vld [vmem:[#allocation8 + $0x38] sm:$0xff] }
 0x5fd   : > { %v1074_v5 = vpop.f32.mrf.mxu2  ;;  %1201 = vmatpush.msrb.mxu3 %v1183_v2 }
 0x5fe   : > { %v2086_v6 = vmul.f32 -1.442695, %v906_v4  ;;  %v1075_v7 = vadd.f32 %v2092_v3, %v1074_v5  ;;  %v1182_v3 = vld [vmem:[#allocation8 + $0x30] sm:$0xff]  ;;  %v1181_v4 = vld [vmem:[#allocation8 + $0x28] sm:$0xff] }
 0x5ff   : > { %1202 = vmatpush.msrb.mxu3 %v1182_v3 }
 0x600   : > { %2272 = vpow2.f32 %v2086_v6  ;;  %vm1077_vm14 = vcmp.gt.f32.partialorder %v1075_v7, 0.0  ;;  %v1078_v9 = vmul.f32 0.1, %v1075_v7 }
 0x601   : > { %1203 = vmatpush.msrb.mxu3 %v1181_v4  ;;  %v1590_v4 = vld [vmem:[#allocation6 + $0x198] sm:$0xff] }
 0x602   : > { %v1079_v10 = vsel %vm1077_vm14, %v1075_v7, %v1078_v9  ;;  %v1180_v7 = vld [vmem:[#allocation8 + $0x20] sm:$0xff] }
 0x603   : > { %2095 = vmatmul.msk.f32.vlgmr.msrb.gmra.mxu0 %vm552_vm2, %v1079_v10  ;;  %1204 = vmatpush.msrb.mxu3 %v1180_v7  ;;  %v1385_v10 = vld [vmem:[#allocation6 + $0x158] sm:$0xff]  ;;  %v1588_v7 = vld [vmem:[#allocation6 + $0x188] sm:$0xff] }
 0x605   : > { %1403 = vmatpush.msra.mxu3 %v1385_v10 }
 0x606   : > { %v2273_v11 = vpop.eup %2272 }
 0x607   : > { %v910_v12 = vadd.f32 1.0, %v2273_v11 }
 0x609   : > { %2274 = vrcp.f32 %v910_v12  ;;  %v922_v17 = vand.u32 2147483648, %v910_v12  ;;  %v920_v19 = vand.u32 2147483647, %v910_v12  ;;  %vm916_vm3 = vweird.f32 %v910_v12 }
 0x60a   : > { %2276 = vrcp.f32 %v1214_v42 }
 0x60b   : > { %v923_v21 = vor.u32 1.1754944e-38, %v922_v17  ;;  %vm921_vm5 = vcmp.eq.f32.partialorder %v920_v19, 8.507059e+37 }
 0x60f   : > { %v2275_v14 = vpop.eup %2274 }
 0x610   : > { %v912_v15 = vmul.f32 %v2275_v14, %v910_v12  ;;  %vm917_vm15 = vweird.f32 %v2275_v14  ;;  %v1384_v12 = vld [vmem:[#allocation6 + $0x150] sm:$0xff]  ;;  %v2277_v46 = vpop.eup %2276 }
 0x611   : > { %vm918_vm4 = vmor %vm916_vm3, %vm917_vm15  ;;  %1404 = vmatpush.msra.mxu3 %v1384_v12  ;;  %v1216_v47 = vmul.f32 %v2277_v46, %v1214_v42  ;;  %vm1221_vm12 = vweird.f32 %v2277_v46 }
 0x612   : > { %v913_v16 = vsub.f32 1.0, %v912_v15  ;;  %v1382_v15 = vld [vmem:[#allocation6 + $0x140] sm:$0xff]  ;;  %vm1222_vm13 = vmor %vm1220_vm11, %vm1221_vm12 }
 0x613   : > { %v1217_v48 = vsub.f32 1.0, %v1216_v47  ;;  %v2266_v47 = vld [vmem:[%s2953_s10 + $0x2] ss:$0 sm:$0xff] }
 0x614   : > { %v914_v18 = vmul.f32 %v2275_v14, %v913_v16 }
 0x616   : > { %v915_v20 = vadd.f32 %v2275_v14, %v914_v18  ;;  %v2265_v18 = vld [vmem:[%s2953_s10 + $0x1] ss:$0 sm:$0xff] }
 0x618   : > { %v919_v22 = vsel %vm918_vm4, %v2275_v14, %v915_v20  ;;  %v1383_v14 = vld [vmem:[#allocation6 + $0x148] sm:$0xff] }
 0x619   : > { %v2788_v23 = vsel %vm921_vm5, %v923_v21, %v919_v22  ;;  %1405 = vmatpush.msra.mxu3 %v1383_v14  ;;  %v2098_v21 = vld [vmem:[%s2948_s5 + $0x7] sm:$0x1] }
 0x61a   : > { %994 = vrot.lane.b32.xlu0 %v2788_v23, %s2524_s28  ;;  %v938_v24 = vperm.slane %v2788_v23, 0  ;;  %v1036_v16 = vsub.f32 1.0, %v2788_v23  ;;  %s2529_s28 = smov 62  }
 0x61b   : > { %1406 = vmatpush.msra.mxu3 %v1382_v15 }
 0x61c   : > { %v939_v25 = vmul.f32 %v938_v24, %v2756_v13 }
 0x61e   : > { %2089 = vmatmul.msk.f32.gmra.mxu3 %vm940_vm6, %v939_v25 }
 0x622   : > { %929 = vperm.xlu0 %2254, %v2788_v23  }
 0x62a   : > { %1307 = vrot.lane.b32.xlu0 %v2265_v18, %s2528_s26 }
 0x680   : > { %v1107_v32 = vpop.f32.mrf.mxu0 }
 0x681   : > { %v1108_v35 = vadd.f32 %v2094_v31, %v1107_v32  ;;  %v1261_v32 = vld [vmem:[#allocation9 + $0x38] sm:$0xff] }
 0x682   : > { %1282 = vmatpush.msra.mxu0 %v1261_v32 }
 0x683   : > { %v1111_v38 = vmul.f32 0.1, %v1108_v35  ;;  %vm1110_vm6 = vcmp.gt.f32.partialorder %v1108_v35, 0.0 }
 0x685   : > { %v1112_v40 = vsel %vm1110_vm6, %v1108_v35, %v1111_v38 }
 0x68c   : > { %v995_v13 = vpop.permute.xlu0 %994 }
 0x68d   : > { %v997_v33 = vmul.f32 %v995_v13, %v2743_v0  ;;  %v1260_v13 = vld [vmem:[#allocation9 + $0x30] sm:$0xff] }
 0x68e   : > { %1283 = vmatpush.msra.mxu0 %v1260_v13 }
 0x68f   : > { %2091 = vmatmul.msk.f32.vlgmr.msrb.gmra.mxu1 %vm552_vm2, %v997_v33  ;;  %v1259_v33 = vld [vmem:[#allocation9 + $0x28] sm:$0xff] }
 0x690   : > { %1337 = vmatpush.msrb.mxu1 %v1322_v34  ;;  %1284 = vmatpush.msra.mxu0 %v1259_v33  ;;  %v1258_v34 = vld [vmem:[#allocation9 + $0x20] sm:$0xff] }
 0x692   : > { %1338 = vmatpush.msrb.mxu1 %v1321_v36  ;;  %1285 = vmatpush.msra.mxu0 %v1258_v34  ;;  %v1021_v36 = vperm.slane %v2795_v30, 0  ;;  %v1417_v30 = vld [vmem:[#allocation6 + $0x170] sm:$0xff] }
 0x693   : > { %v1619_v34 = vld [vmem:[#allocation6 + $0x1b0] sm:$0xff] }
 0x694   : > { %1339 = vmatpush.msrb.mxu1 %v1320_v37  ;;  %v930_v5 = vpop.permute.xlu0 %929  ;;  %v1022_v37 = vadd.f32 %v1021_v36, %v2805_v49  ;;  %v2530_v49 = vmov 64   ;;  %1605 = vmatpush.msrb.mxu0 %v1590_v4  ;;  %v1617_v36 = vld [vmem:[#allocation6 + $0x1a0] sm:$0xff] }
 0x695   : > { %v932_v6 = vmul.f32 %v930_v5, %v2788_v23  ;;  %2255 = vset.pattern.permute.xlu1 %v2530_v49  ;;  %2256 = vset.pattern.permute.xlu0 %v2530_v49  ;;  %v1589_v5 = vld [vmem:[#allocation6 + $0x190] sm:$0xff] }
 0x696   : > { %1340 = vmatpush.msrb.mxu1 %v1319_v39  ;;  %1606 = vmatpush.msrb.mxu0 %v1589_v5 }
 0x697   : > { %2097 = vmatmul.msk.f32.vlgmr.msra.gmra.mxu1 %vm552_vm2, %v1112_v40  ;;  %v1025_v8 = vperm.slane %v932_v6, 0 }
 0x698   : > { %1436 = vmatpush.msra.mxu1 %v1418_v43  ;;  %1607 = vmatpush.msrb.mxu0 %v1588_v7 }
 0x69a   : > { %1437 = vmatpush.msra.mxu1 %v1417_v30 }
 0x69c   : > { %1438 = vmatpush.msra.mxu1 %v1416_v44 }
 0x69e   : > { %1439 = vmatpush.msra.mxu1 %v1415_v45 }
 0x69f   : > { %2108 = vmatmul.msk.f32.vlgmr.msrb.gmra.mxu1 %vm552_vm2, %v2743_v0 }
 0x6a1   : > { %v971_v52 = vpop.f32.mrf.mxu3 }
 0x70c   : > { %v1018_v50 = vpop.f32.mrf.mxu1 }
 0x70d   : > { %v1023_v51 = vperm.slane %v1018_v50, 0  ;;  %v1218_v50 = vmul.f32 %v2277_v46, %v1217_v48 }
 0x70f   : > { %v1024_v53 = vadd.f32 %v1023_v51, %v971_v52  ;;  %v1226_v51 = vand.u32 2147483648, %v1214_v42  ;;  %v1219_v52 = vadd.f32 %v2277_v46, %v1218_v50 }
 0x711   : > { %1027 = vrot.lane.b32.xlu1 %v1024_v53, %s2525_s21  ;;  %v1224_v53 = vand.u32 2147483647, %v1214_v42  ;;  %v2122_v42 = vld [vmem:[%s2948_s5 + $0xc] sm:$0x1]  ;;  %s2532_s21 = smov 63  }
 0x713   : > { %vm1225_vm14 = vcmp.eq.f32.partialorder %v1224_v53, 8.507059e+37 }
 0x714   : > { %v1140_v55 = vpop.f32.mrf.mxu1 }
 0x715   : > { %v1141_v56 = vadd.f32 %v2096_v54, %v1140_v55  ;;  %v2100_v54 = vld [vmem:[%s2950_s7 + $0x1] sm:$0x1] }
 0x717   : > { %vm1143_vm7 = vcmp.gt.f32.partialorder %v1141_v56, 0.0  ;;  %v1144_v58 = vmul.f32 0.1, %v1141_v56 }
 0x719   : > { %v1145_v59 = vsel %vm1143_vm7, %v1141_v56, %v1144_v58  ;;  %1039 = vrot.lane.b32.xlu1 %v2264_v57, %s2526_s18  ;;  %v1227_v56 = vor.u32 1.1754944e-38, %v1226_v51  ;;  %v1223_v58 = vsel %vm1222_vm13, %v2277_v46, %v1219_v52  ;;  %s1479_s18 = smin.f32 %s2522_s23, %s1478_s30  ;;  %s2132_s30 = sld [smem:[#allocation11 + $0x3]] }
 0x71a   : > { %2099 = vmatmul.msk.f32.vlgmr.msrb.gmra.mxu2 %vm552_vm2, %v1145_v59  ;;  %v1482_v49 = vstv %s1479_s18 }
 0x71c   : > { %v1342_v61 = vpop.f32.mrf.mxu1 }
 0x71d   : > { %v1343_v62 = vadd.f32 %v2107_v60, %v1342_v61  ;;  %v1228_v60 = vsel %vm1225_vm14, %v1227_v56, %v1223_v58  ;;  %v1653_v56 = vld [vmem:[#allocation6 + $0x1d8] sm:$0xff] }
 0x71f   : > { %vm1345_vm8 = vcmp.gt.f32.partialorder %v1343_v62, 0.0  ;;  %v1346_v63 = vmul.f32 0.1, %v1343_v62  ;;  %s1746_s18 = smax.f32 %s2521_s19, %s2132_s30  ;;  %s2536_s19 = smov 93  }
 0x721   : > { %v1347_v1 = vsel %vm1345_vm8, %v1343_v62, %v1346_v63  ;;  %v2111_v62 = vld [vmem:[%s2948_s5 + $0xa] sm:$0x1] }
 0x722   : > { %2110 = vmatmul.msk.f32.vlgmr.msra.gmra.mxu2 %vm552_vm2, %v1347_v1 }
 0x783   : > { %v1028_v9 = vpop.permute.xlu1 %1027 }
 0x784   : > { %v1030_v11 = vmul.f32 %v1028_v9, %v1025_v8  ;;  %v1587_v9 = vld [vmem:[#allocation6 + $0x180] sm:$0xff] }
 0x785   : > { %1608 = vmatpush.msrb.mxu0 %v1587_v9 }
 0x786   : > { %1032 = vrot.lane.b32.xlu2 %v1030_v11, %s2527_s27 }
 0x78b   : > { %v1040_v17 = vpop.permute.xlu1 %1039 }
 0x78c   : > { %v1042_v19 = vmul.f32 %v1040_v17, %v1036_v16 }
 0x78e   : > { %v1043_v20 = vperm.slane %v1042_v19, 0 }
 0x790   : > { %1045 = vrot.lane.b32.xlu2 %v1043_v20, %s2529_s28  ;;  %s2531_s28 = smov 32  }
 0x79d   : > { %v1173_v22 = vpop.f32.mrf.mxu2 }
 0x79e   : > { %v1174_v24 = vadd.f32 %v2098_v21, %v1173_v22 }
 0x7a0   : > { %vm1176_vm9 = vcmp.gt.f32.partialorder %v1174_v24, 0.0  ;;  %v1177_v23 = vmul.f32 0.1, %v1174_v24 }
 0x7a2   : > { %v1178_v25 = vsel %vm1176_vm9, %v1174_v24, %v1177_v23  ;;  %v1451_v23 = vld [vmem:[#allocation8 + $0x58] sm:$0xff]  ;;  %vm1488_vm9 = vweird.f32 %v1482_v49 }
 0x7a3   : > { %2101 = vmatmul.msk.f32.vlgmr.msrb.gmra.mxu3 %vm552_vm2, %v1178_v25  ;;  %1469 = vmatpush.msrb.mxu2 %v1451_v23 }
 0x7a5   : > { %v1375_v27 = vpop.f32.mrf.mxu2 }
 0x7a6   : > { %v1376_v28 = vadd.f32 %v2109_v26, %v1375_v27  ;;  %v1450_v26 = vld [vmem:[#allocation8 + $0x50] sm:$0xff]  ;;  %v1449_v27 = vld [vmem:[#allocation8 + $0x48] sm:$0xff] }
 0x7a7   : > { %1470 = vmatpush.msrb.mxu2 %v1450_v26 }
 0x7a8   : > { %vm1378_vm10 = vcmp.gt.f32.partialorder %v1376_v28, 0.0  ;;  %v1379_v29 = vmul.f32 0.1, %v1376_v28 }
 0x7a9   : > { %1471 = vmatpush.msrb.mxu2 %v1449_v27 }
 0x7aa   : > { %v1380_v31 = vsel %vm1378_vm10, %v1376_v28, %v1379_v29  ;;  %v1448_v28 = vld [vmem:[#allocation8 + $0x40] sm:$0xff]  ;;  %v1620_v29 = vld [vmem:[#allocation6 + $0x1b8] sm:$0xff] }
 0x7ab   : > { %2112 = vmatmul.msk.f32.vlgmr.msra.gmra.mxu3 %vm552_vm2, %v1380_v31  ;;  %1472 = vmatpush.msrb.mxu2 %v1448_v28  ;;  %v2113_v31 = vld [vmem:[%s2948_s5 + $0xb] sm:$0x1] }
 0x7ac   : > { %1638 = vmatpush.msrb.mxu1 %v1620_v29 }
 0x7ad   : > { %1671 = vmatpush.msra.mxu2 %v1653_v56  ;;  %v1717_v56 = vld [vmem:[#allocation8 + $0x68] sm:$0xff] }
 0x7ae   : > { %1639 = vmatpush.msrb.mxu1 %v1619_v34 }
 0x7e0   : > { %v1033_v35 = vpop.permute.xlu2 %1032 }
 0x7e1   : > { %v1035_v38 = vsub.f32 %v1022_v37, %v1033_v35 }
 0x7ea   : > { %v1046_v39 = vpop.permute.xlu2 %1045 }
 0x7eb   : > { %v2834_v40 = vadd.f32 %v1046_v39, %v1035_v38  ;;  %v1308_v39 = vpop.permute.xlu0 %1307 }
 0x7ed   : > { %v1049_v41 = vmax.f32 %v2834_v40, 0.0 }
 0x7ef   : > { %2105 = vmatmul.msk.f32.vlgmr.msra.gmra.mxu0 %vm552_vm2, %v1049_v41 }
 0x826   : > { %v1206_v55 = vpop.f32.mrf.mxu3 }
 0x827   : > { %v1207_v57 = vadd.f32 %v2100_v54, %v1206_v55 }
 0x829   : > { %v1212_v59 = vmax.f32 %v1207_v57, -1.0 }
 0x82b   : > { %v1213_v61 = vmin.f32 %v1212_v59, 2.5  ;;  %v1494_v59 = vand.u32 2147483648, %v1482_v49 }
 0x82d   : > { %v1229_v63 = vmul.f32 %v1228_v60, %v1213_v61  ;;  %v1492_v61 = vand.u32 2147483647, %v1482_v49 }
 0x82e   : > { %v1408_v1 = vpop.f32.mrf.mxu3 }
 0x82f   : > { %v2103_v2 = vmul.f32 -1.442695, %v1229_v63  ;;  %v1409_v3 = vadd.f32 %v2111_v62, %v1408_v1  ;;  %v1652_v62 = vld [vmem:[#allocation6 + $0x1d0] sm:$0xff]  ;;  %v2115_v63 = vld [vmem:[%s2950_s7 + $0x2] sm:$0x1]  ;;  %v1651_v1 = vld [vmem:[#allocation6 + $0x1c8] sm:$0xff] }
 0x830   : > { %1672 = vmatpush.msra.mxu2 %v1652_v62  ;;  %vm1493_vm12 = vcmp.eq.f32.partialorder %v1492_v61, 8.507059e+37 }
 0x831   : > { %2278 = vpow2.f32 %v2103_v2  ;;  %vm1411_vm15 = vcmp.gt.f32.partialorder %v1409_v3, 0.0  ;;  %v1412_v6 = vmul.f32 0.1, %v1409_v3 }
 0x832   : > { %1673 = vmatpush.msra.mxu2 %v1651_v1 }
 0x833   : > { %v1413_v8 = vsel %vm1411_vm15, %v1409_v3, %v1412_v6  ;;  %v1495_v3 = vor.u32 1.1754944e-38, %v1494_v59  ;;  %v1650_v6 = vld [vmem:[#allocation6 + $0x1c0] sm:$0xff] }
 0x834   : > { %2114 = vmatmul.msk.f32.vlgmr.msra.gmra.mxu1 %vm552_vm2, %v1413_v8  ;;  %1674 = vmatpush.msra.mxu2 %v1650_v6 }
 0x837   : > { %v2279_v10 = vpop.eup %2278 }
 0x838   : > { %v1233_v11 = vadd.f32 1.0, %v2279_v10 }
 0x83a   : > { %2280 = vrcp.f32 %v1233_v11  ;;  %v1245_v16 = vand.u32 2147483648, %v1233_v11  ;;  %v1243_v18 = vand.u32 2147483647, %v1233_v11  ;;  %vm1239_vm4 = vweird.f32 %v1233_v11 }
 0x83b   : > { %2282 = vrcp.f32 %v1482_v49 }
 0x83c   : > { %v1246_v20 = vor.u32 1.1754944e-38, %v1245_v16  ;;  %vm1244_vm6 = vcmp.eq.f32.partialorder %v1243_v18, 8.507059e+37 }
 0x840   : > { %v2281_v12 = vpop.eup %2280 }
 0x841   : > { %v1235_v14 = vmul.f32 %v2281_v12, %v1233_v11  ;;  %vm1240_vm3 = vweird.f32 %v2281_v12  ;;  %v2283_v53 = vpop.eup %2282 }
 0x842   : > { %vm1241_vm5 = vmor %vm1239_vm4, %vm1240_vm3  ;;  %v1484_v55 = vmul.f32 %v2283_v53, %v1482_v49  ;;  %vm1489_vm10 = vweird.f32 %v2283_v53 }
 0x843   : > { %v1236_v15 = vsub.f32 1.0, %v1235_v14  ;;  %vm1490_vm11 = vmor %vm1488_vm9, %vm1489_vm10 }
 0x844   : > { %v1485_v57 = vsub.f32 1.0, %v1484_v55  ;;  %v1718_v55 = vld [vmem:[#allocation8 + $0x70] sm:$0xff] }
 0x845   : > { %v1237_v17 = vmul.f32 %v2281_v12, %v1236_v15 }
 0x846   : > { %v1486_v58 = vmul.f32 %v2283_v53, %v1485_v57  ;;  %v1716_v57 = vld [vmem:[#allocation8 + $0x60] sm:$0xff] }
 0x847   : > { %v1238_v19 = vadd.f32 %v2281_v12, %v1237_v17  ;;  %v2124_v17 = vld [vmem:[%s2948_s5 + $0xd] sm:$0x1] }
 0x848   : > { %v1487_v60 = vadd.f32 %v2283_v53, %v1486_v58  ;;  %v2128_v58 = vld [vmem:[%s2948_s5 + $0xf] sm:$0x1] }
 0x849   : > { %v1242_v21 = vsel %vm1241_vm5, %v2281_v12, %v1238_v19  ;;  %v1529_v12 = vld [vmem:[#allocation9 + $0x58] sm:$0xff] }
 0x84a   : > { %v1247_v22 = vsel %vm1244_vm6, %v1246_v20, %v1242_v21  ;;  %v1491_v5 = vsel %vm1490_vm11, %v2283_v53, %v1487_v60  ;;  %1550 = vmatpush.msrb.mxu3 %v1529_v12 }
 0x84b   : > { %1253 = vperm.xlu1 %2255, %v1247_v22   ;;  %v1262_v24 = vperm.slane %v1247_v22, 0  ;;  %v1304_v38 = vsub.f32 1.0, %v1247_v22  ;;  %v1496_v8 = vsel %vm1493_vm12, %v1495_v3, %v1491_v5 }
 0x84d   : > { %v1263_v25 = vmul.f32 %v1262_v24, %v1049_v41  ;;  %v1310_v41 = vmul.f32 %v1308_v39, %v1304_v38  ;;  %v1526_v38 = vld [vmem:[#allocation9 + $0x40] sm:$0xff] }
 0x84f   : > { %2106 = vmatmul.msk.f32.gmra.mxu0 %vm552_vm2, %v1263_v25  ;;  %v1311_v43 = vperm.slane %v1310_v41, 0 }
 0x857   : > { %2123 = vmatmul.msk.f32.vlgmr.msrb.gmra.mxu0 %vm552_vm2, %v2743_v0  ;;  %v1618_v0 = vld [vmem:[#allocation6 + $0x1a8] sm:$0xff] }
 0x858   : > { %1640 = vmatpush.msrb.mxu1 %v1618_v0  ;;  %v1528_v0 = vld [vmem:[#allocation9 + $0x50] sm:$0xff] }
 0x859   : > { %1551 = vmatpush.msrb.mxu3 %v1528_v0 }
 0x85a   : > { %1641 = vmatpush.msrb.mxu1 %v1617_v36  ;;  %v1527_v36 = vld [vmem:[#allocation9 + $0x48] sm:$0xff] }
 0x85b   : > { %1552 = vmatpush.msrb.mxu3 %v1527_v36 }
 0x85d   : > { %1553 = vmatpush.msrb.mxu3 %v1526_v38 }
 0x86c   : > { %v2858_v37 = vpop.f32.mrf.mxu0 }
 0x8b1   : > { %v1441_v32 = vpop.f32.mrf.mxu1 }
 0x8b2   : > { %v1442_v13 = vadd.f32 %v2113_v31, %v1441_v32 }
 0x8b4   : > { %vm1444_vm7 = vcmp.gt.f32.partialorder %v1442_v13, 0.0  ;;  %v1445_v33 = vmul.f32 0.1, %v1442_v13 }
 0x8b6   : > { %v1446_v35 = vsel %vm1444_vm7, %v1442_v13, %v1445_v33 }
 0x8b7   : > { %2116 = vmatmul.msk.f32.vlgmr.msrb.gmra.mxu2 %vm552_vm2, %v1446_v35 }
 0x8bd   : > { %v1254_v48 = vpop.permute.xlu1 %1253 }
 0x8be   : > { %v1256_v50 = vmul.f32 %v1254_v48, %v1247_v22 }
 0x8c0   : > { %v1293_v51 = vperm.slane %v1256_v50, 0 }
 0x8cc   : > { %v1290_v40 = vpop.f32.mrf.mxu0 }
 0x8cd   : > { %1295 = vrot.lane.b32.xlu2 %v1290_v40, %s2531_s28 }
 0x8d4   : > { %v1610_v30 = vpop.f32.mrf.mxu0 }
 0x8d5   : > { %v1611_v44 = vadd.f32 %v2122_v42, %v1610_v30  ;;  %1313 = vrot.lane.b32.xlu2 %v1311_v43, %s2532_s21 }
 0x8d7   : > { %vm1613_vm8 = vcmp.gt.f32.partialorder %v1611_v44, 0.0  ;;  %v1614_v45 = vmul.f32 0.1, %v1611_v44 }
 0x8d9   : > { %v1615_v46 = vsel %vm1613_vm8, %v1611_v44, %v1614_v45  ;;  %v1686_v44 = vld [vmem:[#allocation6 + $0x1f8] sm:$0xff]  ;;  %v1685_v45 = vld [vmem:[#allocation6 + $0x1f0] sm:$0xff] }
 0x8da   : > { %2125 = vmatmul.msk.f32.vlgmr.msrb.gmra.mxu1 %vm552_vm2, %v1615_v46  ;;  %1704 = vmatpush.msra.mxu0 %v1686_v44  ;;  %v1684_v46 = vld [vmem:[#allocation6 + $0x1e8] sm:$0xff] }
 0x8dc   : > { %1705 = vmatpush.msra.mxu0 %v1685_v45 }
 0x8dd   : > { %1575 = vrot.lane.b32.xlu2 %v2266_v47, %s2528_s26  ;;  %v1683_v47 = vld [vmem:[#allocation6 + $0x1e0] sm:$0xff]  ;;  %s1747_s26 = smin.f32 %s2522_s23, %s1746_s18  ;;  %s496_s23 = sand.u32 1, %s2503_s22  }
 0x8de   : > { %1706 = vmatpush.msra.mxu0 %v1684_v46  ;;  %v1750_v6 = vstv %s1747_s26  ;;  %s1910_s29 = scalar_lea.sflag [#allocation4], %s496_s23  ;;  %s2453_s26 = scalar_lea.hbm %s2955_s12, 16 }
 0x8df   : > { %vm1756_vm7 = vweird.f32 %v1750_v6  ;;  %v1762_v12 = vand.u32 2147483648, %v1750_v6 }
 0x8e0   : > { %1707 = vmatpush.msra.mxu0 %v1683_v47 }
 0x927   : > { %v1296_v52 = vpop.permute.xlu2 %1295 }
 0x928   : > { %v1298_v54 = vmul.f32 %v1296_v52, %v1293_v51  ;;  %v1719_v52 = vld [vmem:[#allocation8 + $0x78] sm:$0xff] }
 0x929   : > { %1737 = vmatpush.msra.mxu1 %v1719_v52 }
 0x92a   : > { %1300 = vrot.lane.b32.xlu1 %v1298_v54, %s2533_s20 }
 0x92b   : > { %1738 = vmatpush.msra.mxu1 %v1718_v55 }
 0x92d   : > { %1739 = vmatpush.msra.mxu1 %v1717_v56 }
 0x92f   : > { %v1314_v19 = vpop.permute.xlu2 %1313  ;;  %1740 = vmatpush.msra.mxu1 %v1716_v57 }
 0x937   : > { %v1576_v13 = vpop.permute.xlu2 %1575 }
 0x93a   : > { %v1474_v2 = vpop.f32.mrf.mxu2 }
 0x93b   : > { %v1475_v4 = vadd.f32 %v2115_v63, %v1474_v2  ;;  %v2267_v63 = vld [vmem:[%s2953_s10 + $0x3] ss:$0 sm:$0xff] }
 0x93d   : > { %v1480_v7 = vmax.f32 %v1475_v4, -1.0 }
 0x93f   : > { %v1481_v9 = vmin.f32 %v1480_v7, 2.5 }
 0x941   : > { %v1497_v10 = vmul.f32 %v1496_v8, %v1481_v9 }
 0x943   : > { %v2118_v11 = vmul.f32 -1.442695, %v1497_v10  ;;  %v2535_v10 = vmov 34  }
 0x945   : > { %2284 = vpow2.f32 %v2118_v11 }
 0x94b   : > { %v2285_v14 = vpop.eup %2284 }
 0x94c   : > { %v1501_v15 = vadd.f32 1.0, %v2285_v14 }
 0x94e   : > { %2286 = vrcp.f32 %v1501_v15  ;;  %v1513_v24 = vand.u32 2147483648, %v1501_v15  ;;  %v1511_v25 = vand.u32 2147483647, %v1501_v15  ;;  %vm1507_vm15 = vweird.f32 %v1501_v15 }
 0x94f   : > { %2288 = vrcp.f32 %v1750_v6 }
 0x950   : > { %v1514_v29 = vor.u32 1.1754944e-38, %v1513_v24  ;;  %vm1512_vm4 = vcmp.eq.f32.partialorder %v1511_v25, 8.507059e+37 }
 0x954   : > { %v2287_v16 = vpop.eup %2286 }
 0x955   : > { %v1503_v18 = vmul.f32 %v2287_v16, %v1501_v15  ;;  %vm1508_vm13 = vweird.f32 %v2287_v16  ;;  %v2289_v7 = vpop.eup %2288  ;;  %v1760_v15 = vand.u32 2147483647, %v1750_v6 }
 0x956   : > { %vm1509_vm3 = vmor %vm1507_vm15, %vm1508_vm13  ;;  %v1752_v8 = vmul.f32 %v2289_v7, %v1750_v6  ;;  %vm1757_vm8 = vweird.f32 %v2289_v7 }
 0x957   : > { %v1643_v20 = vpop.f32.mrf.mxu1  ;;  %v1504_v21 = vsub.f32 1.0, %v1503_v18  ;;  %vm1758_vm9 = vmor %vm1756_vm7, %vm1757_vm8  ;;  %v1763_v18 = vor.u32 1.1754944e-38, %v1762_v12  ;;  %vm1761_vm10 = vcmp.eq.f32.partialorder %v1760_v15, 8.507059e+37 }
 0x958   : > { %v1644_v22 = vadd.f32 %v2124_v17, %v1643_v20  ;;  %v1753_v9 = vsub.f32 1.0, %v1752_v8 }
 0x959   : > { %v1505_v23 = vmul.f32 %v2287_v16, %v1504_v21 }
 0x95a   : > { %vm1646_vm14 = vcmp.gt.f32.partialorder %v1644_v22, 0.0  ;;  %v1647_v26 = vmul.f32 0.1, %v1644_v22  ;;  %v1754_v11 = vmul.f32 %v2289_v7, %v1753_v9 }
 0x95b   : > { %v1506_v27 = vadd.f32 %v2287_v16, %v1505_v23 }
 0x95c   : > { %v1648_v28 = vsel %vm1646_vm14, %v1644_v22, %v1647_v26  ;;  %v1755_v14 = vadd.f32 %v2289_v7, %v1754_v11  ;;  %v1797_v26 = vld [vmem:[#allocation9 + $0x78] sm:$0xff] }
 0x95d   : > { %2127 = vmatmul.msk.f32.vlgmr.msra.gmra.mxu2 %vm552_vm2, %v1648_v28  ;;  %v1510_v31 = vsel %vm1509_vm3, %v2287_v16, %v1506_v27  ;;  %v2130_v16 = vld [vmem:[%s2950_s7 + $0x3] sm:$0x1]  ;;  %v1796_v28 = vld [vmem:[#allocation9 + $0x70] sm:$0xff] }
 0x95e   : > { %v1515_v32 = vsel %vm1512_vm4, %v1514_v29, %v1510_v31  ;;  %v1759_v20 = vsel %vm1758_vm9, %v2289_v7, %v1755_v14  ;;  %1818 = vmatpush.msrb.mxu2 %v1797_v26  ;;  %v1795_v31 = vld [vmem:[#allocation9 + $0x68] sm:$0xff] }
 0x95f   : > { %1521 = vperm.xlu0 %2256, %v1515_v32   ;;  %v1572_v33 = vsub.f32 1.0, %v1515_v32  ;;  %v1530_v43 = vperm.slane %v1515_v32, 0  ;;  %v1764_v22 = vsel %vm1761_vm10, %v1763_v18, %v1759_v20 }
 0x960   : > { %1819 = vmatpush.msrb.mxu2 %v1796_v28 }
 0x961   : > { %v1578_v34 = vmul.f32 %v1576_v13, %v1572_v33 }
 0x962   : > { %1820 = vmatpush.msrb.mxu2 %v1795_v31 }
 0x963   : > { %v1579_v35 = vperm.slane %v1578_v34, 0 }
 0x965   : > { %1581 = vrot.lane.b32.xlu2 %v1579_v35, %s2532_s21 }
 0x967   : > { %2257 = vset.pattern.permute.xlu0 %v2535_v10 }
 0x96d   : > { %1843 = vrot.lane.b32.xlu2 %v2267_v63, %s2534_s4 }
 0x99c   : > { %v1301_v39 = vpop.permute.xlu1 %1300 }
 0x99d   : > { %v1303_v40 = vsub.f32 %v2858_v37, %v1301_v39  ;;  %v2126_v37 = vld [vmem:[%s2948_s5 + $0xe] sm:$0x1] }
 0x99f   : > { %v1316_v41 = vadd.f32 %v1314_v19, %v1303_v40 }
 0x9a1   : > { %v1317_v42 = vmax.f32 %v1316_v41, 0.0 }
 0x9a3   : > { %2120 = vmatmul.msk.f32.vlgmr.msrb.gmra.mxu3 %vm552_vm2, %v1317_v42  ;;  %v1531_v30 = vmul.f32 %v1530_v43, %v1317_v42 }
 0x9ab   : > { %2121 = vmatmul.msk.f32.gmra.mxu3 %vm552_vm2, %v1531_v30 }
 0x9bf   : > { %v1582_v34 = vpop.permute.xlu2 %1581 }
 0x9c7   : > { %v1844_v43 = vpop.permute.xlu2 %1843 }
 0x9d1   : > { %v1522_v1 = vpop.permute.xlu0 %1521 }
 0x9d2   : > { %v1524_v2 = vmul.f32 %v1522_v1, %v1515_v32  ;;  %v1794_v32 = vld [vmem:[#allocation9 + $0x60] sm:$0xff] }
 0x9d3   : > { %1821 = vmatpush.msrb.mxu2 %v1794_v32 }
 0x9d4   : > { %v1561_v3 = vperm.slane %v1524_v2, 0 }
 0x9e0   : > { %v1676_v48 = vpop.f32.mrf.mxu2 }
 0x9e1   : > { %v1677_v49 = vadd.f32 %v2126_v37, %v1676_v48 }
 0x9e3   : > { %vm1679_vm5 = vcmp.gt.f32.partialorder %v1677_v49, 0.0  ;;  %v1680_v50 = vmul.f32 0.1, %v1677_v49 }
 0x9e5   : > { %v1681_v51 = vsel %vm1679_vm5, %v1677_v49, %v1680_v50 }
 0x9e6   : > { %2129 = vmatmul.msk.f32.vlgmr.msra.gmra.mxu0 %vm552_vm2, %v1681_v51 }
 0xa26   : > { %v2888_v53 = vpop.f32.mrf.mxu3 }
 0xa2e   : > { %v1558_v54 = vpop.f32.mrf.mxu3 }
 0xa2f   : > { %1563 = vrot.lane.b32.xlu1 %v1558_v54, %s2531_s28 }
 0xa63   : > { %v1709_v59 = vpop.f32.mrf.mxu0 }
 0xa64   : > { %v1710_v60 = vadd.f32 %v2128_v58, %v1709_v59 }
 0xa66   : > { %vm1712_vm6 = vcmp.gt.f32.partialorder %v1710_v60, 0.0  ;;  %v1713_v61 = vmul.f32 0.1, %v1710_v60 }
 0xa68   : > { %v1714_v62 = vsel %vm1712_vm6, %v1710_v60, %v1713_v61  ;;  %v2537_v61 = vmov 0.0  }
 0xa69   : > { %2131 = vmatmul.msk.f32.vlgmr.msra.gmra.mxu1 %vm552_vm2, %v1714_v62 }
 0xaa1   : > { %v1564_v4 = vpop.permute.xlu1 %1563 }
 0xaa2   : > { %v1566_v5 = vmul.f32 %v1564_v4, %v1561_v3 }
 0xaa4   : > { %1568 = vrot.lane.b32.xlu1 %v1566_v5, %s2533_s20 }
 0xae6   : > { %v1742_v17 = vpop.f32.mrf.mxu1 }
 0xae7   : > { %v1743_v19 = vadd.f32 %v2130_v16, %v1742_v17 }
 0xae9   : > { %v1748_v21 = vmax.f32 %v1743_v19, -1.0 }
 0xaeb   : > { %v1749_v24 = vmin.f32 %v1748_v21, 2.5 }
 0xaed   : > { %v1765_v23 = vmul.f32 %v1764_v22, %v1749_v24 }
 0xaef   : > { %v2133_v25 = vmul.f32 -1.442695, %v1765_v23 }
 0xaf1   : > { %2290 = vpow2.f32 %v2133_v25 }
 0xaf7   : > { %v2291_v27 = vpop.eup %2290 }
 0xaf8   : > { %v1769_v29 = vadd.f32 1.0, %v2291_v27 }
 0xafa   : > { %2292 = vrcp.f32 %v1769_v29  ;;  %v1781_v0 = vand.u32 2147483648, %v1769_v29  ;;  %v1779_v38 = vand.u32 2147483647, %v1769_v29  ;;  %vm1775_vm12 = vweird.f32 %v1769_v29 }
 0xafc   : > { %v1782_v40 = vor.u32 1.1754944e-38, %v1781_v0  ;;  %vm1780_vm14 = vcmp.eq.f32.partialorder %v1779_v38, 8.507059e+37 }
 0xb00   : > { %v2293_v13 = vpop.eup %2292 }
 0xb01   : > { %v1771_v33 = vmul.f32 %v2293_v13, %v1769_v29  ;;  %vm1776_vm11 = vweird.f32 %v2293_v13 }
 0xb02   : > { %vm1777_vm13 = vmor %vm1775_vm12, %vm1776_vm11 }
 0xb03   : > { %v1772_v35 = vsub.f32 1.0, %v1771_v33 }
 0xb05   : > { %v1773_v36 = vmul.f32 %v2293_v13, %v1772_v35 }
 0xb07   : > { %v1774_v39 = vadd.f32 %v2293_v13, %v1773_v36 }
 0xb09   : > { %v1778_v41 = vsel %vm1777_vm13, %v2293_v13, %v1774_v39 }
 0xb0a   : > { %v1783_v42 = vsel %vm1780_vm14, %v1782_v40, %v1778_v41 }
 0xb0b   : > { %1789 = vperm.xlu0 %2257, %v1783_v42   ;;  %v1840_v30 = vsub.f32 1.0, %v1783_v42  ;;  %v1798_v49 = vperm.slane %v1783_v42, 0 }
 0xb0d   : > { %v1846_v44 = vmul.f32 %v1844_v43, %v1840_v30 }
 0xb0f   : > { %v1847_v45 = vperm.slane %v1846_v44, 0 }
 0xb11   : > { %1849 = vrot.lane.b32.xlu2 %v1847_v45, %s2536_s19 }
 0xb16   : > { %v1569_v46 = vpop.permute.xlu1 %1568 }
 0xb17   : > { %v1571_v47 = vsub.f32 %v2888_v53, %v1569_v46  ;;  %v1853_v53 = vlaneseq }
 0xb19   : > { %v1584_v37 = vadd.f32 %v1582_v34, %v1571_v47  ;;  %v1854_v59 = vand.u32 127, %v1853_v53  ;;  %v1878_v60 = vshrl.u32 %v1853_v53, 7 }
 0xb1b   : > { %v1585_v48 = vmax.f32 %v1584_v37, 0.0  ;;  %vm1879_vm15 = vcmp.eq.s32.totalorder %v1878_v60, %v1854_v59  ;;  %vm1855_vm3 = vcmp.lt.s32.totalorder %v1854_v59, 1 }
 0xb1c   : > { %v2137_v62 = vsel %vm1879_vm15, 1.0, %v2537_v61 }
 0xb1d   : > { %2135 = vmatmul.msk.f32.vlgmr.msrb.gmra.mxu2 %vm552_vm2, %v1585_v48  ;;  %v1799_v50 = vmul.f32 %v1798_v49, %v1585_v48  ;;  %2138 = vmatpush.msk.msra.mxu3 %vm517_vm0, %v2137_v62 }
 0xb25   : > { %2136 = vmatmul.msk.f32.gmra.mxu2 %vm552_vm2, %v1799_v50 }
 0xb6b   : > { %v1850_v2 = vpop.permute.xlu2 %1849 }
 0xb7d   : > { %v1790_v54 = vpop.permute.xlu0 %1789 }
 0xb7e   : > { %v1792_v55 = vmul.f32 %v1790_v54, %v1783_v42 }
 0xb80   : > { %v1829_v56 = vperm.slane %v1792_v55, 0 }
 0xba0   : > { %v1823_v51 = vpop.f32.mrf.mxu2 }
 0xba8   : > { %v1826_v52 = vpop.f32.mrf.mxu2 }
 0xba9   : > { %1831 = vrot.lane.b32.xlu1 %v1826_v52, %s2531_s28  ;;  %s2063_s28 = sshll.u32 %s496_s23, 3 }
 0xbaa   : > { %s498_s2 = scalar_lea.vmem [#allocation12], %s2063_s28 }
 0xbab   : > { %s1922_s21 = sshll.u32 %s498_s2, 4  ;;  %s1923_s21 = int_to_ptr.vmem [resolvable:$true] %s1922_s21 }
 0xc1b   : > { %v1832_v57 = vpop.permute.xlu1 %1831 }
 0xc1c   : > { %v1834_v58 = vmul.f32 %v1832_v57, %v1829_v56 }
 0xc1e   : > { %1836 = vrot.lane.b32.xlu1 %v1834_v58, %s2533_s20  ;;  %s2141_s20 = sshll.u32 %s2624_s25, 3 }
 0xc1f   : > { %s1920_s16 = scalar_lea.hbm %s2955_s12, %s2141_s20 }
 0xc20   : > { %s1924_s17 = sshll.u32 %s1920_s16, 4  ;;  %s1925_s17 = int_to_ptr.hbm [resolvable:$true] %s1924_s17 }
 0xc21   : > { %s2447_s4 = sshra.s32 %s1925_s17, 4  ;;  %s2448_s4 = int_to_ptr.hbm [resolvable:$true] %s2447_s4 }
 0xc22   : > { %s2449_s30 = scalar_lea.hbm %s2448_s4, 8  ;;  %p2454_p3 = scmp.lt.s32.totalorder %s2448_s4, %s2955_s12 }
 0xc23   : > { %p2450_p0 = scmp.ne.s32.totalorder %s2448_s4, %s2449_s30  ;;  %p2455_p4 = scmp.lt.s32.totalorder %s2453_s26, %s2449_s30 }
 0xc25   : > { %p2451_p1 = pnand %p2450_p0, %p2641_p5  ;;  %p2456_p7 = por %p2455_p4, %p2454_p3 }
 0xc27   : > { %p2452_p2 = pneg %p2451_p1 }
 0xc29   : > { %p2457_p8 = pnand %p2456_p7, %p2452_p2 }
 0xc90   : > { %v1837_v63 = vpop.permute.xlu1 %1836 }
 0xc91   : > { %v1839_v1 = vsub.f32 %v1823_v51, %v1837_v63 }
 0xc93   : > { %v1852_v3 = vadd.f32 %v1850_v2, %v1839_v1 }
 0xc95   : > { %v1859_v4 = vand.u32 2147483647, %v1852_v3  ;;  %v1856_v16 = vmax.f32 %v1852_v3, 0.0  ;;  %vm1857_vm2 = vcmp.ne.f32.partialorder %v1852_v3, %v1852_v3 }
 0xc97   : > { %v1860_v5 = vsub.f32 0.0, %v1859_v4 }
 0xc99   : > { %v1861_v6 = vmul.f32 1.442695, %v1860_v5 }
 0xc9b   : > { %2294 = vpow2.f32 %v1861_v6 }
 0xca1   : > { %v2295_v7 = vpop.eup %2294 }
 0xca2   : > { %v1863_v8 = vadd.f32 1.0, %v2295_v7  ;;  %v1866_v9 = vmul.f32 -0.5, %v2295_v7  ;;  %v1869_v11 = vand.u32 2147483647, %v2295_v7 }
 0xca4   : > { %2296 = vlog2.f32 %v1863_v8  ;;  %v1867_v10 = vadd.f32 1.0, %v1866_v9  ;;  %vm1870_vm0 = vcmp.lt.f32.partialorder %v1869_v11, 0.0004427343 }
 0xca6   : > { %v1868_v15 = vmul.f32 %v2295_v7, %v1867_v10 }
 0xcaa   : > { %v2297_v12 = vpop.eup %2296 }
 0xcab   : > { %v1865_v14 = vmul.f32 0.6931472, %v2297_v12 }
 0xcad   : > { %v1871_v17 = vsel %vm1870_vm0, %v1868_v15, %v1865_v14 }
 0xcae   : > { %v1872_v18 = vadd.f32 %v1871_v17, %v1856_v16 }
 0xcb0   : > { %v1873_v19 = vsel %vm1857_vm2, %v1852_v3, %v1872_v18 }
 0xcb1   : > { %v1874_v20 = vmul.f32 0.9, %v1873_v19 }
 0xcb3   : > { %v1875_v21 = vadd.f32 0.1, %v1874_v20 }
 0xcb5   : > { %v1876_v22 = vsel %vm1855_vm3, %v1852_v3, %v1875_v21 }
 0xcb6   : > { %2139 = vmatmul.msk.f32.vlgmr.msra.gmra.mxu3 %vm513_vm1, %v1876_v22 }
 0xd39   : > { %v1905_v24 = vpop.f32.mrf.mxu3 }
 0xd3a   : > { %1908 = vst [vmem:[%s498_s2] sm:$0xff] %v1905_v24 }
 0xd3b   : > { %2460 = shalt.err (!%p2457_p8)
}
 0xd3c   : > { %2164 = dma.vmem_to_hbm [thread:$0]  (%p2641_p5), %s1923_s21, 128, %s1925_s17, %s1910_s29  }
 0xd3d PF: > { %s2976_s19 = sld [smem:[#allocation20_spill]] }
 0xd3e   : > { %s2977_s23 = sld [smem:[#allocation18_spill]] }
 0xd43   : > { %p2196_p9 = scmp.ge.s32.totalorder %s2976_s19, 2 }
 0xd44   : > { %s1936_s20 = sand.u32 1, %s2977_s23  }
 0xd45   : > { %p2183_p10 = pnand %p2196_p9, %p2645_p6  ;;  %s1937_s14 = scalar_lea.sflag [#allocation4], %s1936_s20 }
 0xd47   : > { %p2184_p11 = pneg %p2183_p10 }
 0xd49   : > { %2494 = dma.done.wait (%p2184_p11), %s1937_s14, 128  }
 0xd4a   : > { %2496 = vsyncadd (%p2184_p11), %s1937_s14, 4294967168  ;;  %s2979_s24 = sld [smem:[#allocation21_spill]]  ;;  %s2982_s21 = smov %s2503_s22 }
 0xd4b   : > { %s2980_s15 = sld [smem:[#allocation19_spill]] }
 0xd4c   : > { %s2981_s23 = sld [smem:[#allocation22_spill]] }
 0xd50   : > { %p26_p12 = scmp.ge.s32.totalorder %s2979_s24, 4  }
 0xd51   : > { %s2983_s22 = smov %s2980_s15 }
 0xd52   :  { %28 = sbr.rel (!%p26_p12) target bundleno = 10 (0xa), region = 180 }
 0xd57   :  { %1943 = vsyncpa [#allocation3], 1 }
 0xd58   :  { %1945 = vsyncpa [#allocation3 + $0x1], 1 }
 0xd59   :  { %1946 = vsyncpa [#allocation7], 1 }
 0xd5a   :  { %1947 = vsyncpa [#allocation10], 1 }
 0xd5b   :  { %1948 = vsyncpa [#allocation4], 1 }
 0xd5c   :  { %1950 = vsyncpa [#allocation4 + $0x1], 1 }
 0xd5d   :  { %1951 = vsyncpa [#allocation5], 1 }
 0xd5e   :  { %1953 = vsyncpa [#allocation5 + $0x1], 1 }

</bundles_post_ra>
